<compile_context>
chip_gen: v7x
topology: tpu7x:2x2x1
jax: 0.10.0
libtpu: 0.0.40
codegen_flags: <defaults>
</compile_context>

<pallas_src>
import numpy as np

import jax
import jax.numpy as jnp
from jax.experimental import pallas as pl
from jax.experimental.pallas import tpu as pltpu


def _round_up(x: int, m: int) -> int:
    return (x + m - 1) // m * m


def _get_preprocess_shape(oldh: int, oldw: int, long_side_length: int):
    scale = long_side_length * 1.0 / max(oldh, oldw)
    newh, neww = oldh * scale, oldw * scale
    neww = int(neww + 0.5)
    newh = int(newh + 0.5)
    return newh, neww


def _bilinear_matrix_np(old_size: int, new_size: int) -> np.ndarray:
    """(new_size, old_size) interpolation matrix matching PyTorch
    F.interpolate(mode='bilinear', align_corners=False, antialias=False)."""
    scale = old_size / new_size
    dst = np.arange(new_size, dtype=np.float64)
    src = np.maximum((dst + 0.5) * scale - 0.5, 0.0)          # PyTorch lower clamp
    i0 = np.clip(np.floor(src).astype(np.int64), 0, old_size - 1)
    i1 = np.minimum(i0 + 1, old_size - 1)
    lam1 = (src - i0).astype(np.float32)
    lam0 = (1.0 - lam1).astype(np.float32)
    w = np.zeros((new_size, old_size), dtype=np.float32)
    rows = np.arange(new_size)
    np.add.at(w, (rows, i0), lam0)
    np.add.at(w, (rows, i1), lam1)
    return w


def _src_row_bounds(old_size: int, new_size: int, r0: int, r1: int):
    """[min, max] source rows touched by output rows [r0, r1) (2-tap bilinear)."""
    rows = np.arange(r0, r1, dtype=np.float64)
    src = np.maximum((rows + 0.5) * (old_size / new_size) - 0.5, 0.0)
    i0 = np.clip(np.floor(src).astype(np.int64), 0, old_size - 1)
    i1 = np.minimum(i0 + 1, old_size - 1)
    return int(i0.min()), int(i1.max())


def _resize_kernel(starts_ref, img_lo_ref, img_hi_ref, wh_ref, wwt_ref, out_ref,
                   row_ref):
    # starts_ref : SMEM (h_tiles,) i32  -- consumed by the index_maps only.
    # img_lo/hi  : (C, B, oldw_pad)     bf16  two adjacent B-row input windows
    # wh_ref     : (2, tm, B)           bf16  windowed row-interp weights (lo/hi halves)
    # wwt_ref    : (oldw_pad, neww_pad) bf16  column-interp matrix (transposed), resident
    # out_ref    : (C, tm, neww_pad)    image dtype
    # row_ref    : (C, tm, oldw_pad)    bf16  scratch holding the row-interp result
    del starts_ref
    num_c = img_lo_ref.shape[0]
    wh_lo = wh_ref[0]
    wh_hi = wh_ref[1]
    for ch in range(num_c):                                   # C is small and static
        r = jnp.dot(wh_lo, img_lo_ref[ch], preferred_element_type=jnp.float32)
        r = r + jnp.dot(wh_hi, img_hi_ref[ch], preferred_element_type=jnp.float32)
        row_ref[ch] = r.astype(jnp.bfloat16)
    cc, tm, w = row_ref.shape
    # Channel-fused column matmul: one (C*tm, W) @ (W, neww_pad) GEMM.
    rows = row_ref[...].reshape(cc * tm, w)
    out = jnp.dot(rows, wwt_ref[...], preferred_element_type=jnp.float32)
    out_ref[...] = out.reshape(out_ref.shape).astype(out_ref.dtype)


def resize_longest_side(image: jax.Array, long_side_length: int,
                        interpolation: str = "bilinear",
                        _max_tm: int | None = None) -> jax.Array:
    """Pallas-TPU implementation of ResizeLongestSide.forward (NCHW, bilinear)."""
    assert interpolation == "bilinear", "only bilinear is supported"
    assert jnp.issubdtype(image.dtype, jnp.floating), (
        "float input required (matches torch.nn.functional.interpolate)")
    n, c, oldh, oldw = image.shape

    if max(oldh, oldw) == long_side_length:                   # identity fast path (exact)
        return image

    newh, neww = _get_preprocess_shape(oldh, oldw, long_side_length)
    out_dtype = image.dtype
    out_isz = jnp.dtype(out_dtype).itemsize

    # Lane-dense padding: last dims become multiples of 128.
    oldw_pad = _round_up(oldw, 128)
    neww_pad = _round_up(neww, 128)

    # --- Generation-aware VMEM budget (v7x 64 MiB fallback). ---
    try:
        vmem_cap = int(getattr(pltpu.get_tpu_info(), "vmem_capacity_bytes", 64 << 20))
    except Exception:
        vmem_cap = 64 << 20
    budget = int(vmem_cap * 0.65)
    vmem_limit = int(vmem_cap * 0.85)

    def window_rows(tm: int) -> int:
        """B (multiple of 16): input-row window height covering every tm-row out tile."""
        h_tiles = -(-newh // tm)
        span = 1
        for h in range(h_tiles):
            lo, hi = _src_row_bounds(oldh, newh, h * tm, min((h + 1) * tm, newh))
            span = max(span, hi - lo + 1)
        return _round_up(max(span, 16), 16)

    def vmem_usage(tm: int, b: int) -> int:
        img_b = 2 * 2 * c * b * oldw_pad * 2       # two windows, double-buffered, bf16
        wh_b = 2 * 2 * tm * b * 2                  # (2,tm,B) bf16, double-buffered
        wwt_b = 2 * oldw_pad * neww_pad * 2        # counted double even if Buffered(1)
        row_b = c * tm * oldw_pad * 2              # bf16 scratch
        out_b = 2 * c * tm * neww_pad * out_isz    # double-buffered output
        live = tm * oldw_pad * 4 + c * tm * neww_pad * 4     # f32 matmul results
        return img_b + wh_b + wwt_b + row_b + out_b + live + (2 << 20)

    # Pick the largest output-row tile tm that fits the VMEM budget.
    tm_upper = min(_round_up(newh, 16), 512)
    if n == 1 and newh > 16:
        # Ensure >= 2 blocks on a parallel grid axis (v7x has 2 TensorCores per chip).
        tm_upper = min(tm_upper, _round_up(-(-newh // 2), 16))
    if _max_tm is not None:
        tm_upper = min(tm_upper, max(16, _round_up(_max_tm, 16)))
    cands = sorted({t for t in (512, 256, 128, 64, 32, 16) if t <= tm_upper}
                   | {tm_upper}, reverse=True)
    tm, B = cands[-1], window_rows(cands[-1])
    for t in cands:
        b = window_rows(t)
        if vmem_usage(t, b) <= budget:
            tm, B = t, b
            break

    h_tiles = -(-newh // tm)
    newh_pad = h_tiles * tm
    oldh_pad = max(_round_up(oldh, B), 2 * B)      # >= 2 blocks so start+1 stays in bounds
    nblk = oldh_pad // B

    # Per-h-tile window start blocks + windowed (banded) row-interp weights.
    wh_full = _bilinear_matrix_np(oldh, newh)                  # (newh, oldh)
    wh_pad = np.zeros((newh_pad, oldh_pad), np.float32)
    wh_pad[:newh, :oldh] = wh_full
    starts = np.zeros((h_tiles,), np.int32)
    wh_win = np.zeros((h_tiles, 2, tm, B), np.float32)
    for h in range(h_tiles):
        lo, hi = _src_row_bounds(oldh, newh, h * tm, min((h + 1) * tm, newh))
        s = min(max(lo // B, 0), nblk - 2)
        assert s * B <= lo and hi < (s + 2) * B
        starts[h] = s
        win = wh_pad[h * tm:(h + 1) * tm, s * B:(s + 2) * B]
        wh_win[h, 0] = win[:, :B]
        wh_win[h, 1] = win[:, B:]

    ww = _bilinear_matrix_np(oldw, neww)                       # (neww, oldw)
    wwt = np.zeros((oldw_pad, neww_pad), np.float32)
    wwt[:oldw, :neww] = ww.T

    # bf16 MXU operands (f32 accumulation happens on the MXU inside the kernel).
    img = image.astype(jnp.bfloat16)
    img = jnp.pad(img, ((0, 0), (0, 0), (0, oldh_pad - oldh), (0, oldw_pad - oldw)))
    wh_j = jnp.asarray(wh_win, dtype=jnp.bfloat16)
    wwt_j = jnp.asarray(wwt, dtype=jnp.bfloat16)
    starts_j = jnp.asarray(starts, dtype=jnp.int32)

    flops = 2 * n * h_tiles * c * tm * oldw_pad * (2 * B + neww_pad)
    bytes_accessed = (n * h_tiles * c * 2 * B * oldw_pad * 2   # windowed image reads
                      + wh_j.size * 2 + wwt_j.size * 2 + starts_j.size * 4
                      + n * c * newh_pad * neww_pad * out_isz)

    wwt_idx = lambda i, h, st: (0, 0)

    def build(wwt_spec):
        return pl.pallas_call(
            _resize_kernel,
            out_shape=jax.ShapeDtypeStruct((n, c, newh_pad, neww_pad), out_dtype),
            grid_spec=pltpu.PrefetchScalarGridSpec(
                num_scalar_prefetch=1,
                grid=(n, h_tiles),
                in_specs=[
                    # Two adjacent B-row windows, start block looked up per h-tile.
                    pl.BlockSpec((None, c, B, oldw_pad),
                                 lambda i, h, st: (i, 0, st[h], 0)),
                    pl.BlockSpec((None, c, B, oldw_pad),
                                 lambda i, h, st: (i, 0, st[h] + 1, 0)),
                    # Windowed row-interp weights for this h-tile (lo/hi halves).
                    pl.BlockSpec((None, 2, tm, B),
                                 lambda i, h, st: (h, 0, 0, 0)),
                    # Column matrix: constant block index, stays resident in VMEM.
                    wwt_spec,
                ],
                out_specs=pl.BlockSpec((None, c, tm, neww_pad),
                                       lambda i, h, st: (i, 0, h, 0)),
                scratch_shapes=[pltpu.VMEM((c, tm, oldw_pad), jnp.bfloat16)],
            ),
            compiler_params=pltpu.CompilerParams(
                dimension_semantics=("parallel", "parallel"),
                vmem_limit_bytes=vmem_limit,
            ),
            cost_estimate=pl.CostEstimate(
                flops=int(flops), transcendentals=0,
                bytes_accessed=int(bytes_accessed)),
        )

    # The constant Ww^T block only needs a single VMEM buffer (its block index never
    # changes); fall back to the default double buffer if this build rejects it.
    try:
        buffered = getattr(pl, "Buffered", None)
        if buffered is None:
            raise TypeError("pl.Buffered unavailable")
        wwt_spec = pl.BlockSpec((oldw_pad, neww_pad), wwt_idx,
                                pipeline_mode=buffered(1))
        out_padded = build(wwt_spec)(starts_j, img, img, wh_j, wwt_j)
    except Exception:
        wwt_spec = pl.BlockSpec((oldw_pad, neww_pad), wwt_idx)
        out_padded = build(wwt_spec)(starts_j, img, img, wh_j, wwt_j)

    # Strip row/lane padding back to the exact PyTorch output shape.
    return out_padded[:, :, :newh, :neww]


if __name__ == "__main__":
    key = jax.random.PRNGKey(0)
    key_a, key_b, key_c, key_d = jax.random.split(key, 4)

    # --- Upscale: (2, 4, 16, 12), longest side 16 -> 24. ---
    image = jax.random.uniform(key_a, (2, 4, 16, 12), dtype=jnp.float32)
    out = resize_longest_side(image, 24, "bilinear")
    jax.block_until_ready(out)
    assert out.shape == (2, 4, 24, 18), out.shape
    wh32 = jnp.asarray(_bilinear_matrix_np(16, 24))
    ww32 = jnp.asarray(_bilinear_matrix_np(12, 18))
    ref = jnp.einsum("iy,ncyx,jx->ncij", wh32, image, ww32)
    err = float(jnp.max(jnp.abs(out.astype(jnp.float32) - ref)))
    assert err < 5e-2, f"max abs err {err}"

    # --- Downscale with two h-tiles: (1, 3, 40, 64) -> (20, 32). ---
    image2 = jax.random.uniform(key_b, (1, 3, 40, 64), dtype=jnp.float32)
    out2 = resize_longest_side(image2, 32, "bilinear")
    jax.block_until_ready(out2)
    assert out2.shape == (1, 3, 20, 32), out2.shape
    wh32b = jnp.asarray(_bilinear_matrix_np(40, 20))
    ww32b = jnp.asarray(_bilinear_matrix_np(64, 32))
    ref2 = jnp.einsum("iy,ncyx,jx->ncij", wh32b, image2, ref2_ww := ww32b)
    err2 = float(jnp.max(jnp.abs(out2.astype(jnp.float32) - ref2)))
    assert err2 < 5e-2, f"max abs err {err2}"

    # --- Downscale with 3 h-tiles and shifted row windows (exercises the scalar-
    #     prefetched start-block table): (1, 2, 96, 48) -> (48, 24), tm forced to 16. ---
    image3 = jax.random.uniform(key_c, (1, 2, 96, 48), dtype=jnp.float32)
    out3 = resize_longest_side(image3, 48, "bilinear", _max_tm=16)
    jax.block_until_ready(out3)
    assert out3.shape == (1, 2, 48, 24), out3.shape
    wh32c = jnp.asarray(_bilinear_matrix_np(96, 48))
    ww32c = jnp.asarray(_bilinear_matrix_np(48, 24))
    ref3 = jnp.einsum("iy,ncyx,jx->ncij", wh32c, image3, ww32c)
    err3 = float(jnp.max(jnp.abs(out3.astype(jnp.float32) - ref3)))
    assert err3 < 5e-2, f"max abs err {err3}"

    # --- Identity path: longest side already equals the target. ---
    image_id = jax.random.uniform(key_d, (2, 4, 24, 18), dtype=jnp.float32)
    out_id = resize_longest_side(image_id, 24, "bilinear")
    jax.block_until_ready(out_id)
    assert out_id.shape == image_id.shape
    assert bool(jnp.all(out_id == image_id))

    print("KERNEL_OK")
</pallas_src>

<mosaic_0001>
module attributes {stable_mosaic.version = 11 : i64} {
  func.func @_resize_kernel(%arg0: i32, %arg1: i32, %arg2: memref<1xi32, #tpu.memory_space<smem>>, %arg3: memref<1x4x16x128xbf16, #tpu.memory_space<vmem>>, %arg4: memref<1x4x16x128xbf16, #tpu.memory_space<vmem>>, %arg5: memref<1x2x32x16xbf16, #tpu.memory_space<vmem>>, %arg6: memref<128x128xbf16, #tpu.memory_space<vmem>>, %arg7: memref<1x4x32x128xf32, #tpu.memory_space<vmem>>, %arg8: memref<4x32x128xbf16, #tpu.memory_space<vmem>>) attributes {dimension_semantics = [#tpu.dimension_semantics<parallel>, #tpu.dimension_semantics<parallel>], iteration_bounds = array<i64: 2, 1>, scalar_prefetch = 1 : i64, scratch_operands = 1 : i64, tpu.core_type = #tpu.core_type<tc>, window_params = [{transform_indices = @transform_0, window_bounds = array<i64: 1, 4, 16, 128>}, {transform_indices = @transform_1, window_bounds = array<i64: 1, 4, 16, 128>}, {transform_indices = @transform_2, window_bounds = array<i64: 1, 2, 32, 16>}, {pipeline_mode = #tpu.pipeline_mode<synchronous>, transform_indices = @transform_3, window_bounds = array<i64: 128, 128>}, {transform_indices = @transform_4, window_bounds = array<i64: 1, 4, 32, 128>}]} {
    %c0 = arith.constant 0 : index
    %c0_0 = arith.constant 0 : index
    %c0_1 = arith.constant 0 : index
    %c0_2 = arith.constant 0 : index
    %0 = vector.load %arg5[%c0, %c0_0, %c0_1, %c0_2] : memref<1x2x32x16xbf16, #tpu.memory_space<vmem>>, vector<1x1x32x16xbf16>
    %1 = vector.shape_cast %0 : vector<1x1x32x16xbf16> to vector<32x16xbf16>
    %c0_3 = arith.constant 0 : index
    %c1 = arith.constant 1 : index
    %c0_4 = arith.constant 0 : index
    %c0_5 = arith.constant 0 : index
    %2 = vector.load %arg5[%c0_3, %c1, %c0_4, %c0_5] : memref<1x2x32x16xbf16, #tpu.memory_space<vmem>>, vector<1x1x32x16xbf16>
    %3 = vector.shape_cast %2 : vector<1x1x32x16xbf16> to vector<32x16xbf16>
    %c0_6 = arith.constant 0 : index
    %c0_7 = arith.constant 0 : index
    %c0_8 = arith.constant 0 : index
    %c0_9 = arith.constant 0 : index
    %4 = vector.load %arg3[%c0_6, %c0_7, %c0_8, %c0_9] : memref<1x4x16x128xbf16, #tpu.memory_space<vmem>>, vector<1x1x16x128xbf16>
    %5 = vector.shape_cast %4 : vector<1x1x16x128xbf16> to vector<16x128xbf16>
    %cst = arith.constant dense<0.000000e+00> : vector<32x128xf32>
    %6 = tpu.matmul %1, %5, %cst {dimension_numbers = #tpu.dot_dimension_numbers<[1], [0], [0], [1], [0, 0, 1, 1], [], []>} : vector<32x16xbf16>, vector<16x128xbf16>, vector<32x128xf32> -> vector<32x128xf32>
    %c0_10 = arith.constant 0 : index
    %c0_11 = arith.constant 0 : index
    %c0_12 = arith.constant 0 : index
    %c0_13 = arith.constant 0 : index
    %7 = vector.load %arg4[%c0_10, %c0_11, %c0_12, %c0_13] : memref<1x4x16x128xbf16, #tpu.memory_space<vmem>>, vector<1x1x16x128xbf16>
    %8 = vector.shape_cast %7 : vector<1x1x16x128xbf16> to vector<16x128xbf16>
    %cst_14 = arith.constant dense<0.000000e+00> : vector<32x128xf32>
    %9 = tpu.matmul %3, %8, %cst_14 {dimension_numbers = #tpu.dot_dimension_numbers<[1], [0], [0], [1], [0, 0, 1, 1], [], []>} : vector<32x16xbf16>, vector<16x128xbf16>, vector<32x128xf32> -> vector<32x128xf32>
    %10 = arith.addf %6, %9 : vector<32x128xf32>
    %11 = arith.truncf %10 : vector<32x128xf32> to vector<32x128xbf16>
    %c0_15 = arith.constant 0 : index
    %c0_16 = arith.constant 0 : index
    %c0_17 = arith.constant 0 : index
    %12 = vector.load %arg8[%c0_15, %c0_16, %c0_17] : memref<4x32x128xbf16, #tpu.memory_space<vmem>>, vector<1x32x128xbf16>
    %13 = vector.shape_cast %12 : vector<1x32x128xbf16> to vector<32x128xbf16>
    %14 = vector.shape_cast %11 : vector<32x128xbf16> to vector<1x32x128xbf16>
    tpu.vector_store %arg8[%c0_15, %c0_16, %c0_17], %14 {strides = array<i32>} : memref<4x32x128xbf16, #tpu.memory_space<vmem>>, vector<1x32x128xbf16>,
    %c0_18 = arith.constant 0 : index
    %c1_19 = arith.constant 1 : index
    %c0_20 = arith.constant 0 : index
    %c0_21 = arith.constant 0 : index
    %15 = vector.load %arg3[%c0_18, %c1_19, %c0_20, %c0_21] : memref<1x4x16x128xbf16, #tpu.memory_space<vmem>>, vector<1x1x16x128xbf16>
    %16 = vector.shape_cast %15 : vector<1x1x16x128xbf16> to vector<16x128xbf16>
    %cst_22 = arith.constant dense<0.000000e+00> : vector<32x128xf32>
    %17 = tpu.matmul %1, %16, %cst_22 {dimension_numbers = #tpu.dot_dimension_numbers<[1], [0], [0], [1], [0, 0, 1, 1], [], []>} : vector<32x16xbf16>, vector<16x128xbf16>, vector<32x128xf32> -> vector<32x128xf32>
    %c0_23 = arith.constant 0 : index
    %c1_24 = arith.constant 1 : index
    %c0_25 = arith.constant 0 : index
    %c0_26 = arith.constant 0 : index
    %18 = vector.load %arg4[%c0_23, %c1_24, %c0_25, %c0_26] : memref<1x4x16x128xbf16, #tpu.memory_space<vmem>>, vector<1x1x16x128xbf16>
    %19 = vector.shape_cast %18 : vector<1x1x16x128xbf16> to vector<16x128xbf16>
    %cst_27 = arith.constant dense<0.000000e+00> : vector<32x128xf32>
    %20 = tpu.matmul %3, %19, %cst_27 {dimension_numbers = #tpu.dot_dimension_numbers<[1], [0], [0], [1], [0, 0, 1, 1], [], []>} : vector<32x16xbf16>, vector<16x128xbf16>, vector<32x128xf32> -> vector<32x128xf32>
    %21 = arith.addf %17, %20 : vector<32x128xf32>
    %22 = arith.truncf %21 : vector<32x128xf32> to vector<32x128xbf16>
    %c1_28 = arith.constant 1 : index
    %c0_29 = arith.constant 0 : index
    %c0_30 = arith.constant 0 : index
    %23 = vector.load %arg8[%c1_28, %c0_29, %c0_30] : memref<4x32x128xbf16, #tpu.memory_space<vmem>>, vector<1x32x128xbf16>
    %24 = vector.shape_cast %23 : vector<1x32x128xbf16> to vector<32x128xbf16>
    %25 = vector.shape_cast %22 : vector<32x128xbf16> to vector<1x32x128xbf16>
    tpu.vector_store %arg8[%c1_28, %c0_29, %c0_30], %25 {strides = array<i32>} : memref<4x32x128xbf16, #tpu.memory_space<vmem>>, vector<1x32x128xbf16>,
    %c0_31 = arith.constant 0 : index
    %c2 = arith.constant 2 : index
    %c0_32 = arith.constant 0 : index
    %c0_33 = arith.constant 0 : index
    %26 = vector.load %arg3[%c0_31, %c2, %c0_32, %c0_33] : memref<1x4x16x128xbf16, #tpu.memory_space<vmem>>, vector<1x1x16x128xbf16>
    %27 = vector.shape_cast %26 : vector<1x1x16x128xbf16> to vector<16x128xbf16>
    %cst_34 = arith.constant dense<0.000000e+00> : vector<32x128xf32>
    %28 = tpu.matmul %1, %27, %cst_34 {dimension_numbers = #tpu.dot_dimension_numbers<[1], [0], [0], [1], [0, 0, 1, 1], [], []>} : vector<32x16xbf16>, vector<16x128xbf16>, vector<32x128xf32> -> vector<32x128xf32>
    %c0_35 = arith.constant 0 : index
    %c2_36 = arith.constant 2 : index
    %c0_37 = arith.constant 0 : index
    %c0_38 = arith.constant 0 : index
    %29 = vector.load %arg4[%c0_35, %c2_36, %c0_37, %c0_38] : memref<1x4x16x128xbf16, #tpu.memory_space<vmem>>, vector<1x1x16x128xbf16>
    %30 = vector.shape_cast %29 : vector<1x1x16x128xbf16> to vector<16x128xbf16>
    %cst_39 = arith.constant dense<0.000000e+00> : vector<32x128xf32>
    %31 = tpu.matmul %3, %30, %cst_39 {dimension_numbers = #tpu.dot_dimension_numbers<[1], [0], [0], [1], [0, 0, 1, 1], [], []>} : vector<32x16xbf16>, vector<16x128xbf16>, vector<32x128xf32> -> vector<32x128xf32>
    %32 = arith.addf %28, %31 : vector<32x128xf32>
    %33 = arith.truncf %32 : vector<32x128xf32> to vector<32x128xbf16>
    %c2_40 = arith.constant 2 : index
    %c0_41 = arith.constant 0 : index
    %c0_42 = arith.constant 0 : index
    %34 = vector.load %arg8[%c2_40, %c0_41, %c0_42] : memref<4x32x128xbf16, #tpu.memory_space<vmem>>, vector<1x32x128xbf16>
    %35 = vector.shape_cast %34 : vector<1x32x128xbf16> to vector<32x128xbf16>
    %36 = vector.shape_cast %33 : vector<32x128xbf16> to vector<1x32x128xbf16>
    tpu.vector_store %arg8[%c2_40, %c0_41, %c0_42], %36 {strides = array<i32>} : memref<4x32x128xbf16, #tpu.memory_space<vmem>>, vector<1x32x128xbf16>,
    %c0_43 = arith.constant 0 : index
    %c3 = arith.constant 3 : index
    %c0_44 = arith.constant 0 : index
    %c0_45 = arith.constant 0 : index
    %37 = vector.load %arg3[%c0_43, %c3, %c0_44, %c0_45] : memref<1x4x16x128xbf16, #tpu.memory_space<vmem>>, vector<1x1x16x128xbf16>
    %38 = vector.shape_cast %37 : vector<1x1x16x128xbf16> to vector<16x128xbf16>
    %cst_46 = arith.constant dense<0.000000e+00> : vector<32x128xf32>
    %39 = tpu.matmul %1, %38, %cst_46 {dimension_numbers = #tpu.dot_dimension_numbers<[1], [0], [0], [1], [0, 0, 1, 1], [], []>} : vector<32x16xbf16>, vector<16x128xbf16>, vector<32x128xf32> -> vector<32x128xf32>
    %c0_47 = arith.constant 0 : index
    %c3_48 = arith.constant 3 : index
    %c0_49 = arith.constant 0 : index
    %c0_50 = arith.constant 0 : index
    %40 = vector.load %arg4[%c0_47, %c3_48, %c0_49, %c0_50] : memref<1x4x16x128xbf16, #tpu.memory_space<vmem>>, vector<1x1x16x128xbf16>
    %41 = vector.shape_cast %40 : vector<1x1x16x128xbf16> to vector<16x128xbf16>
    %cst_51 = arith.constant dense<0.000000e+00> : vector<32x128xf32>
    %42 = tpu.matmul %3, %41, %cst_51 {dimension_numbers = #tpu.dot_dimension_numbers<[1], [0], [0], [1], [0, 0, 1, 1], [], []>} : vector<32x16xbf16>, vector<16x128xbf16>, vector<32x128xf32> -> vector<32x128xf32>
    %43 = arith.addf %39, %42 : vector<32x128xf32>
    %44 = arith.truncf %43 : vector<32x128xf32> to vector<32x128xbf16>
    %c3_52 = arith.constant 3 : index
    %c0_53 = arith.constant 0 : index
    %c0_54 = arith.constant 0 : index
    %45 = vector.load %arg8[%c3_52, %c0_53, %c0_54] : memref<4x32x128xbf16, #tpu.memory_space<vmem>>, vector<1x32x128xbf16>
    %46 = vector.shape_cast %45 : vector<1x32x128xbf16> to vector<32x128xbf16>
    %47 = vector.shape_cast %44 : vector<32x128xbf16> to vector<1x32x128xbf16>
    tpu.vector_store %arg8[%c3_52, %c0_53, %c0_54], %47 {strides = array<i32>} : memref<4x32x128xbf16, #tpu.memory_space<vmem>>, vector<1x32x128xbf16>,
    %c0_55 = arith.constant 0 : index
    %c0_56 = arith.constant 0 : index
    %c0_57 = arith.constant 0 : index
    %48 = vector.load %arg8[%c0_55, %c0_56, %c0_57] : memref<4x32x128xbf16, #tpu.memory_space<vmem>>, vector<4x32x128xbf16>
    %49 = vector.shape_cast %48 : vector<4x32x128xbf16> to vector<128x128xbf16>
    %c0_58 = arith.constant 0 : index
    %c0_59 = arith.constant 0 : index
    %50 = vector.load %arg6[%c0_58, %c0_59] : memref<128x128xbf16, #tpu.memory_space<vmem>>, vector<128x128xbf16>
    %cst_60 = arith.constant dense<0.000000e+00> : vector<128x128xf32>
    %51 = tpu.matmul %49, %50, %cst_60 {dimension_numbers = #tpu.dot_dimension_numbers<[1], [0], [0], [1], [0, 0, 1, 1], [], []>} : vector<128x128xbf16>, vector<128x128xbf16>, vector<128x128xf32> -> vector<128x128xf32>
    %52 = vector.shape_cast %51 : vector<128x128xf32> to vector<4x32x128xf32>
    %c0_61 = arith.constant 0 : index
    %c0_62 = arith.constant 0 : index
    %c0_63 = arith.constant 0 : index
    %c0_64 = arith.constant 0 : index
    %53 = vector.load %arg7[%c0_61, %c0_62, %c0_63, %c0_64] : memref<1x4x32x128xf32, #tpu.memory_space<vmem>>, vector<1x4x32x128xf32>
    %54 = vector.shape_cast %53 : vector<1x4x32x128xf32> to vector<4x32x128xf32>
    %55 = vector.shape_cast %52 : vector<4x32x128xf32> to vector<1x4x32x128xf32>
    tpu.vector_store %arg7[%c0_61, %c0_62, %c0_63, %c0_64], %55 {strides = array<i32>} : memref<1x4x32x128xf32, #tpu.memory_space<vmem>>, vector<1x4x32x128xf32>,
    return
  }
  func.func @transform_0(%arg0: i32, %arg1: i32, %arg2: memref<1xi32, #tpu.memory_space<smem>>) -> (i32, i32, i32, i32) {
    %0 = arith.index_cast %arg1 : i32 to index
    %1 = memref.load %arg2[%0] : memref<1xi32, #tpu.memory_space<smem>>
    %c0_i32 = arith.constant 0 : i32
    %c0_i32_0 = arith.constant 0 : i32
    %c0_i32_1 = arith.constant 0 : i32
    return %arg0, %c0_i32, %1, %c0_i32_0 : i32, i32, i32, i32
  }
  func.func @transform_1(%arg0: i32, %arg1: i32, %arg2: memref<1xi32, #tpu.memory_space<smem>>) -> (i32, i32, i32, i32) {
    %0 = arith.index_cast %arg1 : i32 to index
    %1 = memref.load %arg2[%0] : memref<1xi32, #tpu.memory_space<smem>>
    %c1_i32 = arith.constant 1 : i32
    %2 = arith.addi %1, %c1_i32 : i32
    %c0_i32 = arith.constant 0 : i32
    %c0_i32_0 = arith.constant 0 : i32
    %c0_i32_1 = arith.constant 0 : i32
    return %arg0, %c0_i32, %2, %c0_i32_0 : i32, i32, i32, i32
  }
  func.func @transform_2(%arg0: i32, %arg1: i32, %arg2: memref<1xi32, #tpu.memory_space<smem>>) -> (i32, i32, i32, i32) {
    %c0_i32 = arith.constant 0 : i32
    %c0_i32_0 = arith.constant 0 : i32
    %c0_i32_1 = arith.constant 0 : i32
    %c0_i32_2 = arith.constant 0 : i32
    return %arg1, %c0_i32, %c0_i32_0, %c0_i32_1 : i32, i32, i32, i32
  }
  func.func @transform_3(%arg0: i32, %arg1: i32, %arg2: memref<1xi32, #tpu.memory_space<smem>>) -> (i32, i32) {
    %c0_i32 = arith.constant 0 : i32
    %c0_i32_0 = arith.constant 0 : i32
    %c0_i32_1 = arith.constant 0 : i32
    return %c0_i32, %c0_i32_0 : i32, i32
  }
  func.func @transform_4(%arg0: i32, %arg1: i32, %arg2: memref<1xi32, #tpu.memory_space<smem>>) -> (i32, i32, i32, i32) {
    %c0_i32 = arith.constant 0 : i32
    %c0_i32_0 = arith.constant 0 : i32
    %c0_i32_1 = arith.constant 0 : i32
    return %arg0, %c0_i32, %arg1, %c0_i32_0 : i32, i32, i32, i32
  }
}

module attributes {stable_mosaic.version = 11 : i64} {
  func.func @_resize_kernel(%arg0: i32, %arg1: i32, %arg2: memref<1xi32, #tpu.memory_space<smem>>, %arg3: memref<1x4x16x128xbf16, #tpu.memory_space<vmem>>, %arg4: memref<1x4x16x128xbf16, #tpu.memory_space<vmem>>, %arg5: memref<1x2x32x16xbf16, #tpu.memory_space<vmem>>, %arg6: memref<128x128xbf16, #tpu.memory_space<vmem>>, %arg7: memref<1x4x32x128xf32, #tpu.memory_space<vmem>>, %arg8: memref<4x32x128xbf16, #tpu.memory_space<vmem>>) attributes {dimension_semantics = [#tpu.dimension_semantics<parallel>, #tpu.dimension_semantics<parallel>], iteration_bounds = array<i64: 2, 1>, scalar_prefetch = 1 : i64, scratch_operands = 1 : i64, tpu.core_type = #tpu.core_type<tc>, window_params = [{transform_indices = @transform_0, window_bounds = array<i64: 1, 4, 16, 128>}, {transform_indices = @transform_1, window_bounds = array<i64: 1, 4, 16, 128>}, {transform_indices = @transform_2, window_bounds = array<i64: 1, 2, 32, 16>}, {pipeline_mode = #tpu.pipeline_mode<synchronous>, transform_indices = @transform_3, window_bounds = array<i64: 128, 128>}, {transform_indices = @transform_4, window_bounds = array<i64: 1, 4, 32, 128>}]} {
    %c0 = arith.constant 0 : index
    %c0_0 = arith.constant 0 : index
    %c0_1 = arith.constant 0 : index
    %c0_2 = arith.constant 0 : index
    %0 = vector.load %arg5[%c0, %c0_0, %c0_1, %c0_2] : memref<1x2x32x16xbf16, #tpu.memory_space<vmem>>, vector<1x1x32x16xbf16>
    %1 = vector.shape_cast %0 : vector<1x1x32x16xbf16> to vector<32x16xbf16>
    %c0_3 = arith.constant 0 : index
    %c1 = arith.constant 1 : index
    %c0_4 = arith.constant 0 : index
    %c0_5 = arith.constant 0 : index
    %2 = vector.load %arg5[%c0_3, %c1, %c0_4, %c0_5] : memref<1x2x32x16xbf16, #tpu.memory_space<vmem>>, vector<1x1x32x16xbf16>
    %3 = vector.shape_cast %2 : vector<1x1x32x16xbf16> to vector<32x16xbf16>
    %c0_6 = arith.constant 0 : index
    %c0_7 = arith.constant 0 : index
    %c0_8 = arith.constant 0 : index
    %c0_9 = arith.constant 0 : index
    %4 = vector.load %arg3[%c0_6, %c0_7, %c0_8, %c0_9] : memref<1x4x16x128xbf16, #tpu.memory_space<vmem>>, vector<1x1x16x128xbf16>
    %5 = vector.shape_cast %4 : vector<1x1x16x128xbf16> to vector<16x128xbf16>
    %cst = arith.constant dense<0.000000e+00> : vector<32x128xf32>
    %6 = tpu.matmul %1, %5, %cst {dimension_numbers = #tpu.dot_dimension_numbers<[1], [0], [0], [1], [0, 0, 1, 1], [], []>} : vector<32x16xbf16>, vector<16x128xbf16>, vector<32x128xf32> -> vector<32x128xf32>
    %c0_10 = arith.constant 0 : index
    %c0_11 = arith.constant 0 : index
    %c0_12 = arith.constant 0 : index
    %c0_13 = arith.constant 0 : index
    %7 = vector.load %arg4[%c0_10, %c0_11, %c0_12, %c0_13] : memref<1x4x16x128xbf16, #tpu.memory_space<vmem>>, vector<1x1x16x128xbf16>
    %8 = vector.shape_cast %7 : vector<1x1x16x128xbf16> to vector<16x128xbf16>
    %cst_14 = arith.constant dense<0.000000e+00> : vector<32x128xf32>
    %9 = tpu.matmul %3, %8, %cst_14 {dimension_numbers = #tpu.dot_dimension_numbers<[1], [0], [0], [1], [0, 0, 1, 1], [], []>} : vector<32x16xbf16>, vector<16x128xbf16>, vector<32x128xf32> -> vector<32x128xf32>
    %10 = arith.addf %6, %9 : vector<32x128xf32>
    %11 = arith.truncf %10 : vector<32x128xf32> to vector<32x128xbf16>
    %c0_15 = arith.constant 0 : index
    %c0_16 = arith.constant 0 : index
    %c0_17 = arith.constant 0 : index
    %12 = vector.load %arg8[%c0_15, %c0_16, %c0_17] : memref<4x32x128xbf16, #tpu.memory_space<vmem>>, vector<1x32x128xbf16>
    %13 = vector.shape_cast %12 : vector<1x32x128xbf16> to vector<32x128xbf16>
    %14 = vector.shape_cast %11 : vector<32x128xbf16> to vector<1x32x128xbf16>
    tpu.vector_store %arg8[%c0_15, %c0_16, %c0_17], %14 {strides = array<i32>} : memref<4x32x128xbf16, #tpu.memory_space<vmem>>, vector<1x32x128xbf16>,
    %c0_18 = arith.constant 0 : index
    %c1_19 = arith.constant 1 : index
    %c0_20 = arith.constant 0 : index
    %c0_21 = arith.constant 0 : index
    %15 = vector.load %arg3[%c0_18, %c1_19, %c0_20, %c0_21] : memref<1x4x16x128xbf16, #tpu.memory_space<vmem>>, vector<1x1x16x128xbf16>
    %16 = vector.shape_cast %15 : vector<1x1x16x128xbf16> to vector<16x128xbf16>
    %cst_22 = arith.constant dense<0.000000e+00> : vector<32x128xf32>
    %17 = tpu.matmul %1, %16, %cst_22 {dimension_numbers = #tpu.dot_dimension_numbers<[1], [0], [0], [1], [0, 0, 1, 1], [], []>} : vector<32x16xbf16>, vector<16x128xbf16>, vector<32x128xf32> -> vector<32x128xf32>
    %c0_23 = arith.constant 0 : index
    %c1_24 = arith.constant 1 : index
    %c0_25 = arith.constant 0 : index
    %c0_26 = arith.constant 0 : index
    %18 = vector.load %arg4[%c0_23, %c1_24, %c0_25, %c0_26] : memref<1x4x16x128xbf16, #tpu.memory_space<vmem>>, vector<1x1x16x128xbf16>
    %19 = vector.shape_cast %18 : vector<1x1x16x128xbf16> to vector<16x128xbf16>
    %cst_27 = arith.constant dense<0.000000e+00> : vector<32x128xf32>
    %20 = tpu.matmul %3, %19, %cst_27 {dimension_numbers = #tpu.dot_dimension_numbers<[1], [0], [0], [1], [0, 0, 1, 1], [], []>} : vector<32x16xbf16>, vector<16x128xbf16>, vector<32x128xf32> -> vector<32x128xf32>
    %21 = arith.addf %17, %20 : vector<32x128xf32>
    %22 = arith.truncf %21 : vector<32x128xf32> to vector<32x128xbf16>
    %c1_28 = arith.constant 1 : index
    %c0_29 = arith.constant 0 : index
    %c0_30 = arith.constant 0 : index
    %23 = vector.load %arg8[%c1_28, %c0_29, %c0_30] : memref<4x32x128xbf16, #tpu.memory_space<vmem>>, vector<1x32x128xbf16>
    %24 = vector.shape_cast %23 : vector<1x32x128xbf16> to vector<32x128xbf16>
    %25 = vector.shape_cast %22 : vector<32x128xbf16> to vector<1x32x128xbf16>
    tpu.vector_store %arg8[%c1_28, %c0_29, %c0_30], %25 {strides = array<i32>} : memref<4x32x128xbf16, #tpu.memory_space<vmem>>, vector<1x32x128xbf16>,
    %c0_31 = arith.constant 0 : index
    %c2 = arith.constant 2 : index
    %c0_32 = arith.constant 0 : index
    %c0_33 = arith.constant 0 : index
    %26 = vector.load %arg3[%c0_31, %c2, %c0_32, %c0_33] : memref<1x4x16x128xbf16, #tpu.memory_space<vmem>>, vector<1x1x16x128xbf16>
    %27 = vector.shape_cast %26 : vector<1x1x16x128xbf16> to vector<16x128xbf16>
    %cst_34 = arith.constant dense<0.000000e+00> : vector<32x128xf32>
    %28 = tpu.matmul %1, %27, %cst_34 {dimension_numbers = #tpu.dot_dimension_numbers<[1], [0], [0], [1], [0, 0, 1, 1], [], []>} : vector<32x16xbf16>, vector<16x128xbf16>, vector<32x128xf32> -> vector<32x128xf32>
    %c0_35 = arith.constant 0 : index
    %c2_36 = arith.constant 2 : index
    %c0_37 = arith.constant 0 : index
    %c0_38 = arith.constant 0 : index
    %29 = vector.load %arg4[%c0_35, %c2_36, %c0_37, %c0_38] : memref<1x4x16x128xbf16, #tpu.memory_space<vmem>>, vector<1x1x16x128xbf16>
    %30 = vector.shape_cast %29 : vector<1x1x16x128xbf16> to vector<16x128xbf16>
    %cst_39 = arith.constant dense<0.000000e+00> : vector<32x128xf32>
    %31 = tpu.matmul %3, %30, %cst_39 {dimension_numbers = #tpu.dot_dimension_numbers<[1], [0], [0], [1], [0, 0, 1, 1], [], []>} : vector<32x16xbf16>, vector<16x128xbf16>, vector<32x128xf32> -> vector<32x128xf32>
    %32 = arith.addf %28, %31 : vector<32x128xf32>
    %33 = arith.truncf %32 : vector<32x128xf32> to vector<32x128xbf16>
    %c2_40 = arith.constant 2 : index
    %c0_41 = arith.constant 0 : index
    %c0_42 = arith.constant 0 : index
    %34 = vector.load %arg8[%c2_40, %c0_41, %c0_42] : memref<4x32x128xbf16, #tpu.memory_space<vmem>>, vector<1x32x128xbf16>
    %35 = vector.shape_cast %34 : vector<1x32x128xbf16> to vector<32x128xbf16>
    %36 = vector.shape_cast %33 : vector<32x128xbf16> to vector<1x32x128xbf16>
    tpu.vector_store %arg8[%c2_40, %c0_41, %c0_42], %36 {strides = array<i32>} : memref<4x32x128xbf16, #tpu.memory_space<vmem>>, vector<1x32x128xbf16>,
    %c0_43 = arith.constant 0 : index
    %c3 = arith.constant 3 : index
    %c0_44 = arith.constant 0 : index
    %c0_45 = arith.constant 0 : index
    %37 = vector.load %arg3[%c0_43, %c3, %c0_44, %c0_45] : memref<1x4x16x128xbf16, #tpu.memory_space<vmem>>, vector<1x1x16x128xbf16>
    %38 = vector.shape_cast %37 : vector<1x1x16x128xbf16> to vector<16x128xbf16>
    %cst_46 = arith.constant dense<0.000000e+00> : vector<32x128xf32>
    %39 = tpu.matmul %1, %38, %cst_46 {dimension_numbers = #tpu.dot_dimension_numbers<[1], [0], [0], [1], [0, 0, 1, 1], [], []>} : vector<32x16xbf16>, vector<16x128xbf16>, vector<32x128xf32> -> vector<32x128xf32>
    %c0_47 = arith.constant 0 : index
    %c3_48 = arith.constant 3 : index
    %c0_49 = arith.constant 0 : index
    %c0_50 = arith.constant 0 : index
    %40 = vector.load %arg4[%c0_47, %c3_48, %c0_49, %c0_50] : memref<1x4x16x128xbf16, #tpu.memory_space<vmem>>, vector<1x1x16x128xbf16>
    %41 = vector.shape_cast %40 : vector<1x1x16x128xbf16> to vector<16x128xbf16>
    %cst_51 = arith.constant dense<0.000000e+00> : vector<32x128xf32>
    %42 = tpu.matmul %3, %41, %cst_51 {dimension_numbers = #tpu.dot_dimension_numbers<[1], [0], [0], [1], [0, 0, 1, 1], [], []>} : vector<32x16xbf16>, vector<16x128xbf16>, vector<32x128xf32> -> vector<32x128xf32>
    %43 = arith.addf %39, %42 : vector<32x128xf32>
    %44 = arith.truncf %43 : vector<32x128xf32> to vector<32x128xbf16>
    %c3_52 = arith.constant 3 : index
    %c0_53 = arith.constant 0 : index
    %c0_54 = arith.constant 0 : index
    %45 = vector.load %arg8[%c3_52, %c0_53, %c0_54] : memref<4x32x128xbf16, #tpu.memory_space<vmem>>, vector<1x32x128xbf16>
    %46 = vector.shape_cast %45 : vector<1x32x128xbf16> to vector<32x128xbf16>
    %47 = vector.shape_cast %44 : vector<32x128xbf16> to vector<1x32x128xbf16>
    tpu.vector_store %arg8[%c3_52, %c0_53, %c0_54], %47 {strides = array<i32>} : memref<4x32x128xbf16, #tpu.memory_space<vmem>>, vector<1x32x128xbf16>,
    %c0_55 = arith.constant 0 : index
    %c0_56 = arith.constant 0 : index
    %c0_57 = arith.constant 0 : index
    %48 = vector.load %arg8[%c0_55, %c0_56, %c0_57] : memref<4x32x128xbf16, #tpu.memory_space<vmem>>, vector<4x32x128xbf16>
    %49 = vector.shape_cast %48 : vector<4x32x128xbf16> to vector<128x128xbf16>
    %c0_58 = arith.constant 0 : index
    %c0_59 = arith.constant 0 : index
    %50 = vector.load %arg6[%c0_58, %c0_59] : memref<128x128xbf16, #tpu.memory_space<vmem>>, vector<128x128xbf16>
    %cst_60 = arith.constant dense<0.000000e+00> : vector<128x128xf32>
    %51 = tpu.matmul %49, %50, %cst_60 {dimension_numbers = #tpu.dot_dimension_numbers<[1], [0], [0], [1], [0, 0, 1, 1], [], []>} : vector<128x128xbf16>, vector<128x128xbf16>, vector<128x128xf32> -> vector<128x128xf32>
    %52 = vector.shape_cast %51 : vector<128x128xf32> to vector<4x32x128xf32>
    %c0_61 = arith.constant 0 : index
    %c0_62 = arith.constant 0 : index
    %c0_63 = arith.constant 0 : index
    %c0_64 = arith.constant 0 : index
    %53 = vector.load %arg7[%c0_61, %c0_62, %c0_63, %c0_64] : memref<1x4x32x128xf32, #tpu.memory_space<vmem>>, vector<1x4x32x128xf32>
    %54 = vector.shape_cast %53 : vector<1x4x32x128xf32> to vector<4x32x128xf32>
    %55 = vector.shape_cast %52 : vector<4x32x128xf32> to vector<1x4x32x128xf32>
    tpu.vector_store %arg7[%c0_61, %c0_62, %c0_63, %c0_64], %55 {strides = array<i32>} : memref<1x4x32x128xf32, #tpu.memory_space<vmem>>, vector<1x4x32x128xf32>,
    return
  }
  func.func @transform_0(%arg0: i32, %arg1: i32, %arg2: memref<1xi32, #tpu.memory_space<smem>>) -> (i32, i32, i32, i32) {
    %0 = arith.index_cast %arg1 : i32 to index
    %1 = memref.load %arg2[%0] : memref<1xi32, #tpu.memory_space<smem>>
    %c0_i32 = arith.constant 0 : i32
    %c0_i32_0 = arith.constant 0 : i32
    %c0_i32_1 = arith.constant 0 : i32
    return %arg0, %c0_i32, %1, %c0_i32_0 : i32, i32, i32, i32
  }
  func.func @transform_1(%arg0: i32, %arg1: i32, %arg2: memref<1xi32, #tpu.memory_space<smem>>) -> (i32, i32, i32, i32) {
    %0 = arith.index_cast %arg1 : i32 to index
    %1 = memref.load %arg2[%0] : memref<1xi32, #tpu.memory_space<smem>>
    %c1_i32 = arith.constant 1 : i32
    %2 = arith.addi %1, %c1_i32 : i32
    %c0_i32 = arith.constant 0 : i32
    %c0_i32_0 = arith.constant 0 : i32
    %c0_i32_1 = arith.constant 0 : i32
    return %arg0, %c0_i32, %2, %c0_i32_0 : i32, i32, i32, i32
  }
  func.func @transform_2(%arg0: i32, %arg1: i32, %arg2: memref<1xi32, #tpu.memory_space<smem>>) -> (i32, i32, i32, i32) {
    %c0_i32 = arith.constant 0 : i32
    %c0_i32_0 = arith.constant 0 : i32
    %c0_i32_1 = arith.constant 0 : i32
    %c0_i32_2 = arith.constant 0 : i32
    return %arg1, %c0_i32, %c0_i32_0, %c0_i32_1 : i32, i32, i32, i32
  }
  func.func @transform_3(%arg0: i32, %arg1: i32, %arg2: memref<1xi32, #tpu.memory_space<smem>>) -> (i32, i32) {
    %c0_i32 = arith.constant 0 : i32
    %c0_i32_0 = arith.constant 0 : i32
    %c0_i32_1 = arith.constant 0 : i32
    return %c0_i32, %c0_i32_0 : i32, i32
  }
  func.func @transform_4(%arg0: i32, %arg1: i32, %arg2: memref<1xi32, #tpu.memory_space<smem>>) -> (i32, i32, i32, i32) {
    %c0_i32 = arith.constant 0 : i32
    %c0_i32_0 = arith.constant 0 : i32
    %c0_i32_1 = arith.constant 0 : i32
    return %arg0, %c0_i32, %arg1, %c0_i32_0 : i32, i32, i32, i32
  }
}

</mosaic_0001>

<bundles_post_ra>
// kernel: tpu_custom_call.1
= control target key start
LH: loop header
LB: loop body
LE: loop exit
PB: predicated region body
PF: predicated region fallthrough
CT: control target
= control target key end

     0   :  { %s2211_s0 = inlined_call_operand.<no memory space> [shape: s32[1], index: 0, kind: input, shape index: {}]   ;;  %s2212_s1 = inlined_call_operand.hbm [shape: bf16[2,4,32,128], index: 1, kind: input, shape index: {}]   ;;  %s2213_s2 = inlined_call_operand.hbm [shape: bf16[2,4,32,128], index: 2, kind: input, shape index: {}]   ;;  %s2214_s3 = inlined_call_operand.vmem [shape: bf16[1,2,32,16], index: 3, kind: input, shape index: {}]   ;;  %s2215_s4 = inlined_call_operand.hbm [shape: bf16[128,128], index: 4, kind: input, shape index: {}]   ;;  %s2216_s5 = inlined_call_operand.hbm [shape: f32[2,4,32,128], index: 5, kind: output, shape index: {}]  }
   0x1   :  { %2232 = sst [smem:[#allocation32_spill]] %s2215_s4 }
   0x2   :  { %2233 = sst [smem:[#allocation33_spill]] %s2216_s5 }
   0x3   :  { %10 = sst [smem:[#allocation4]] %s2211_s0 }
   0x4   :  { %11 = vsyncpa [#allocation6], 0 }
   0x5   :  { %13 = vsyncpa [#allocation6 + $0x1], 0 }
   0x6   :  { %14 = vsyncpa [#allocation9], 0 }
   0x7   :  { %16 = vsyncpa [#allocation9 + $0x1], 0 }
   0x8   :  { %17 = vsyncpa [#allocation7], 0 }
   0x9   :  { %19 = vsyncpa [#allocation7 + $0x1], 0  ;;  %s1862_s20 = smov 0   ;;  %s1864_s21 = smov 0  }
   0xa   :  { %s1866_s22 = smov 0   ;;  %s1868_s23 = smov 0  }
   0xb   :  { %s1870_s24 = smov 0   ;;  %s1872_s25 = smov 0  }
   0xc   :  { %s1874_s26 = smov 0   ;;  %s1876_s0 = smov 0  }
   0xd   :  { %s1878_s27 = smov 0   ;;  %s1880_s28 = smov 0  }
   0xe   :  { %s1882_s29 = smov 0   ;;  %s1884_s30 = smov 0  }
   0xf LB: > { %2234 = sst [smem:[#allocation22_spill]] %s1765_s20  ;;  %s1919_s6 = sadd.s32 4294967295, %s1809_s30   ;;  %s1809_s30 = sphi %s1884_s30, %s25_s30   ;;  %s1805_s29 = sphi %s1882_s29, %s2281_s29   ;;  %s1801_s28 = sphi %s1880_s28, %s2280_s28   ;;  %s1797_s27 = sphi %s1878_s27, %s2271_s27   ;;  %s1793_s0 = sphi %s1876_s0, %s2279_s0   ;;  %s1789_s26 = sphi %s1874_s26, %s2278_s26   ;;  %s1785_s25 = sphi %s1872_s25, %s2277_s25   ;;  %s1781_s24 = sphi %s1870_s24, %s2276_s24   ;;  %s1777_s23 = sphi %s1868_s23, %s2275_s23   ;;  %s1773_s22 = sphi %s1866_s22, %s2268_s22   ;;  %s1769_s21 = sphi %s1864_s21, %s2274_s21   ;;  %s1765_s20 = sphi %s1862_s20, %s2273_s20  }
  0x10   : > { %2235 = sst [smem:[#allocation23_spill]] %s1773_s22  ;;  %s1243_s7 = sadd.s32 4294967294, %s1809_s30  }
  0x11   : > { %2236 = sst [smem:[#allocation24_spill]] %s1797_s27  ;;  %s37_s8 = sadd.s32 1, %s1805_s29 }
  0x12   : > { %2237 = sst [smem:[#allocation25_spill]] %s1801_s28  ;;  %p39_p0 = scmp.ge.s32.totalorder %s37_s8, 2 }
  0x13   : > { %s48_s9 = sadd.s32 1, %s1797_s27  ;;  %p55_p1 = scmp.ne.s32.totalorder %s1797_s27, %s1793_s0 }
  0x14   : > { %p56_p2 = scmp.eq.s32.totalorder %s1809_s30, 0  ;;  %s2283_s8 = smov (%p39_p0, %s37_s8), 0 }
  0x15   : > { %2238 = sst [smem:[#allocation26_spill]] %s2283_s8  ;;  %p61_p4 = scmp.ne.s32.totalorder %s1793_s0, %s1789_s26 }
  0x16   : > { %p1931_p3 = por %p56_p2, %p55_p1  ;;  %s43_s11 = ssub.s32 %s1805_s29, %s2283_s8 }
  0x17   : > { %p2221_p5 = scmp.eq.s32.totalorder %s1919_s6, 0  ;;  %p46_p7 = scmp.eq.s32.totalorder %s43_s11, 0 }
  0x18   : > { %s2239_s10 = scalar_select %p1931_p3, 1, 0 }
  0x19   : > { %p1941_p6 = por %p2221_p5, %p61_p4  ;;  %s80_s13 = sadd.s32 1, %s1785_s25 }
  0x1a   : > { %s1947_s14 = scalar_select %p46_p7, %s1797_s27, %s48_s9  }
  0x1b   : > { %s2240_s12 = scalar_select %p1941_p6, 1, 0 }
  0x1c   : > { %2241 = sst [smem:[#allocation27_spill]] %s1947_s14  ;;  %p87_p8 = scmp.ne.s32.totalorder %s1785_s25, %s1781_s24 }
  0x1d   : > { %p93_p9 = scmp.ne.s32.totalorder %s1781_s24, %s1777_s23  ;;  %s155_s18 = sadd.s32 1, %s1773_s22 }
  0x1e   : > { %s1953_s15 = scalar_select %p46_p7, %s1785_s25, %s80_s13  }
  0x1f   : > { %p1957_p10 = por %p87_p8, %p56_p2  ;;  %p1963_p11 = por %p93_p9, %p2221_p5 }
  0x20   : > { %2242 = sst [smem:[#allocation28_spill]] %s1953_s15  ;;  %p165_p12 = scmp.ne.s32.totalorder %s1773_s22, %s1769_s21 }
  0x21   : > { %s2243_s16 = scalar_select %p1957_p10, 1, 0 }
  0x22   : > { %s2244_s17 = scalar_select %p1963_p11, 1, 0 }
  0x23   : > { %s1971_s19 = scalar_select %p46_p7, %s1773_s22, %s155_s18  }
  0x24   : > { %p166_p13 = scmp.eq.s32.totalorder %s1919_s6, 1  ;;  %p171_p0 = scmp.ne.s32.totalorder %s1769_s21, %s1765_s20 }
  0x25   : > { %2245 = sst [smem:[#allocation29_spill]] %s1971_s19  ;;  %p172_p1 = scmp.eq.s32.totalorder %s1243_s7, 1 }
  0x26   : > { %p1244_p4 = scmp.ge.s32.totalorder %s1809_s30, 1  ;;  %p1977_p6 = por %p166_p13, %p165_p12 }
  0x27   : > { %p179_p2 = scmp.lt.s32.totalorder %s1809_s30, 3  ;;  %p1982_p8 = por %p172_p1, %p171_p0 }
  0x28   : > { %s2246_s23 = scalar_select %p1977_p6, 1, 0 }
  0x29   : > { %s2248_s26 = scalar_select %p1982_p8, 1, 0 }
  0x2a   : > { %2247 = sst [smem:[#allocation30_spill]] %s2246_s23  ;;  %p1986_p9 = pnand %p1244_p4, %p179_p2 }
  0x2b   : > { %2249 = sst [smem:[#allocation31_spill]] %s2248_s26  ;;  %s1811_s11 = smov [#allocation10]  }
  0x2c   : > { %s2250_s9 = scalar_select %p1986_p9, 1, 0 }
  0x2d   : > { %s199_s13 = sshll.u32 %s1811_s11, 4  ;;  %p1499_p7 = pneg %p1986_p9  ;;  %s200_s13 = int_to_ptr.vmem [resolvable:$true] %s199_s13 }
  0x2e   : > { %s2252_s4 = sld [smem:[#allocation32_spill]] }
  0x2f   : > { %p1994_p12 = pnand %p1499_p7, %p2221_p5 }
  0x31   : > { %p1645_p0 = pneg %p1994_p12 }
  0x34   : > { %s1643_s14 = scalar_lea.hbm %s2252_s4, 1024 }
  0x35   : > { %p1644_p13 = scmp.ne.s32.totalorder %s2252_s4, %s1643_s14  ;;  %p1650_p2 = scmp.lt.u32.totalorder %s1643_s14, %s2252_s4 }
  0x37   : > { %p1646_p1 = pnand %p1645_p0, %p1644_p13 }
  0x39   : > { %p1647_p4 = pneg %p1646_p1 }
  0x3b   : > { %p1652_p7 = pnand %p1650_p2, %p1647_p4 }
  0x3d   : > { %1655 = shalt.err (!%p1652_p7)
}
  0x3e   : > { %s1656_s26 = scalar_lea.vmem %s200_s13, 1024  ;;  %p1664_p11 = scmp.lt.s32.totalorder %s200_s13, %s200_s13 }
  0x3f   : > { %p1657_p5 = scmp.ne.s32.totalorder %s200_s13, %s1656_s26  ;;  %p1665_p9 = scmp.lt.s32.totalorder %s1656_s26, %s1656_s26 }
  0x41   : > { %p1659_p8 = pnand %p1657_p5, %p1645_p0  ;;  %p1666_p10 = por %p1665_p9, %p1664_p11 }
  0x43   : > { %p1660_p6 = pneg %p1659_p8 }
  0x45   : > { %p1667_p3 = pnand %p1666_p10, %p1660_p6 }
  0x47   : > { %1670 = shalt.err (!%p1667_p3)
}
  0x48   : > { %s1812_s8 = smov 64   ;;  %s1813_s15 = smov 4  }
  0x49   : > { %1502 = dma.hbm_to_vmem [thread:$0]  (!%p1994_p12), %s2252_s4, 1024, %s200_s13, [#allocation9], %s1812_s8, %s1812_s8, %s1813_s15  }
  0x4a   : > { %p1247_p13 = scmp.ge.s32.totalorder %s1809_s30, 2 }
  0x4c   : > { %209 = sbr.rel (%p1247_p13) target bundleno = 115 (0x73), region = 24 }
  0x53   : > { %s213_s22 = sand.u32 1, %s1797_s27   ;;  %s218_s14 = sld [smem:[#allocation4]] }
  0x54   : > { %s1248_s26 = sshll.u32 %s213_s22, 5  ;;  %s1250_s7 = sshll.u32 %s1805_s29, 4 }
  0x55   : > { %p2253_p3 = scmp.ne.s32.totalorder %s2239_s10, 0  ;;  %s217_s19 = scalar_lea.vmem [#allocation5], %s1248_s26 }
  0x56   : > { %s239_s13 = sshll.u32 %s217_s19, 4  ;;  %s1814_s18 = smov 256   ;;  %s240_s13 = int_to_ptr.vmem [resolvable:$true] %s239_s13 }
  0x57   : > { %s1477_s11 = scalar_select %p2253_p3, [#allocation0], [#allocation16] }
  0x58   : > { %1478 = sst [smem:[#allocation13]] (%p2253_p3), %s1814_s18  ;;  %s1815_s20 = smov 128  }
  0x59   : > { %s231_s8 = sld [smem:[%s1477_s11]]   ;;  %s1249_s15 = sshll.u32 %s218_s14, 1 }
  0x5a   : > { %s224_s4 = sadd.s32 %s1250_s7, %s1249_s15  ;;  %1479 = sst [smem:[#allocation13 + $0x1]] (%p2253_p3), %s1815_s20 }
  0x5b   : > { %s1251_s27 = sshll.u32 %s224_s4, 6  ;;  %s1816_s19 = smov 2  }
  0x5c   : > { %s226_s26 = scalar_lea.hbm %s2212_s1, %s1251_s27  ;;  %1480 = sst [smem:[#allocation13 + $0x2]] (%p2253_p3), %s1816_s19 }
  0x5d   : > { %s1817_s14 = smov 64   ;;  %s1818_s15 = smov 4  }
  0x5e   : > { %1481 = sst [smem:[#allocation13 + $0x3]] (%p2253_p3), %s1817_s14  ;;  %s214_s4 = scalar_lea.sflag [#allocation6], %s213_s22 }
  0x5f   : > { %s1252_s11 = sshll.u32 %s231_s8, 26  ;;  %1482 = sst [smem:[#allocation13 + $0x4]] (%p2253_p3), %s1817_s14 }
  0x60   : > { %s1253_s28 = sadd.s32 134217728, %s1252_s11  ;;  %1483 = sst [smem:[#allocation13 + $0x5]] (%p2253_p3), %s1818_s15 }
  0x61   : > { %s1819_s18 = smov [#allocation12]  }
  0x62   : > { %1484 = dma.general (%p2253_p3), %s226_s26, 512, %s240_s13, %s214_s4, %s1819_s18, [#allocation13], %s1253_s28, 0  }
  0x63   : > { %s262_s5 = sand.u32 1, %s1809_s30   ;;  %s264_s20 = sand.u32 1, %s1785_s25  }
  0x64   : > { %s1254_s27 = sshll.u32 %s264_s20, 5  ;;  %s267_s23 = sld [smem:[#allocation4]] }
  0x65   : > { %p2254_p5 = scmp.ne.s32.totalorder %s2243_s16, 0  ;;  %s266_s19 = scalar_lea.vmem [#allocation8], %s1254_s27 }
  0x66   : > { %s289_s11 = sshll.u32 %s266_s19, 4  ;;  %s1820_s28 = smov 256   ;;  %s290_s11 = int_to_ptr.vmem [resolvable:$true] %s289_s11 }
  0x67   : > { %s1485_s8 = scalar_select %p2254_p5, [#allocation0], [#allocation17] }
  0x68   : > { %1486 = sst [smem:[#allocation15]] (%p2254_p5), %s1820_s28  ;;  %s1821_s10 = smov 128  }
  0x69   : > { %s281_s22 = sld [smem:[%s1485_s8]]   ;;  %s1822_s26 = smov 2  }
  0x6a   : > { %1487 = sst [smem:[#allocation15 + $0x1]] (%p2254_p5), %s1821_s10  ;;  %s1255_s13 = sshll.u32 %s267_s23, 1 }
  0x6b   : > { %1488 = sst [smem:[#allocation15 + $0x2]] (%p2254_p5), %s1822_s26  ;;  %s1149_s14 = sadd.s32 %s1255_s13, %s1250_s7 }
  0x6c   : > { %s1257_s15 = sshll.u32 %s1149_s14, 6  ;;  %s1823_s4 = smov 64  }
  0x6d   : > { %1489 = sst [smem:[#allocation15 + $0x3]] (%p2254_p5), %s1823_s4  ;;  %s1151_s27 = scalar_lea.hbm %s2213_s2, %s1257_s15 }
  0x6e   : > { %s1152_s19 = scalar_lea.hbm %s1151_s27, 128  ;;  %1490 = sst [smem:[#allocation15 + $0x4]] (%p2254_p5), %s1823_s4 }
  0x6f   : > { %s1258_s8 = sshll.u32 %s281_s22, 26  ;;  %s1824_s23 = smov 4  }
  0x70   : > { %s1259_s28 = sadd.s32 134217728, %s1258_s8  ;;  %1491 = sst [smem:[#allocation15 + $0x5]] (%p2254_p5), %s1824_s23 }
  0x71   : > { %s263_s10 = scalar_lea.sflag [#allocation9], %s262_s5  ;;  %s1825_s26 = smov [#allocation14]  }
  0x72   : > { %1492 = dma.general (%p2254_p5), %s1152_s19, 512, %s290_s11, %s263_s10, %s1825_s26, [#allocation15], %s1259_s28, 0  }
  0x73 PF: > { %p2255_p6 = scmp.ne.s32.totalorder %s2250_s9, 0 }
  0x74   : > { %s316_s7 = sand.u32 (!%p2255_p6), 1, %s1793_s0   ;;  %p2256_p10 = scmp.ne.s32.totalorder (!%p2255_p6), %s2240_s12, 0 }
  0x75   : > { %314 = sbr.rel (%p2255_p6) target bundleno = 626 (0x272), region = 36  ;;  %s1261_s13 = sshll.u32 (!%p2255_p6), %s316_s7, 5 }
  0x76   : > { %s317_s22 = scalar_lea.sflag (!%p2255_p6), [#allocation6], %s316_s7  ;;  %s2066_s14 = scalar_lea.vmem (!%p2255_p6), [#allocation5], %s1261_s13 }
  0x7c   : > { %1748 = dma.done.wait (%p2256_p10), %s317_s22, 512  }
  0x7d   : > { %1750 = vsyncadd (%p2256_p10), %s317_s22, 4294966784  ;;  %s325_s16 = sand.u32 1, %s1919_s6   ;;  %s327_s5 = sand.u32 1, %s1781_s24  }
  0x7e   : > { %s1262_s11 = sshll.u32 %s327_s5, 5  ;;  %s326_s9 = scalar_lea.sflag [#allocation9], %s325_s16 }
  0x7f   : > { %s329_s15 = scalar_lea.vmem [#allocation8], %s1262_s11  ;;  %p2257_p11 = scmp.ne.s32.totalorder %s2244_s17, 0 }
  0x81   : > { %1752 = dma.done.wait (%p2257_p11), %s326_s9, 512  }
  0x82   : > { %1754 = vsyncadd (%p2257_p11), %s326_s9, 4294966784  ;;  %p2258_p8 = scmp.eq.s32.totalorder %s1919_s6, 0 }
  0x84   : > { %1756 = dma.done.wait (%p2258_p8), [#allocation9], 1024   ;;  %p2259_p9 = pmov %p2258_p8 }
  0x85   : > { %v1623_v0 = vld [vmem:[%s329_s15] sm:$0xff]   ;;  %v1624_v1 = vld [vmem:[%s329_s15 + $0x8] sm:$0xff]   ;;  %vm409_vm0 = vcmask 130048   ;;  %v1625_v2 = vld [vmem:[%s2214_s3 + $0x10] sm:$0xff]   ;;  %s365_s19 = sand.u32 1, %s1769_s21   ;;  %s2260_s10 = sld [smem:[#allocation25_spill]] }
  0x86   : > { %1758 = vsyncadd (%p2259_p9), [#allocation9], 4294966272  ;;  %1363 = vmatprep.subr.bf16.mxu0 %v1623_v0  ;;  %1375 = vmatprep.subr.bf16.mxu1 %v1624_v1  ;;  %v1626_v3 = vld [vmem:[%s2214_s3 + $0x18] sm:$0xff]   ;;  %v1627_v4 = vld [vmem:[%s2066_s14] sm:$0xff]   ;;  %s1264_s28 = sshll.u32 %s365_s19, 7  ;;  %s2261_s26 = sld [smem:[#allocation30_spill]] }
  0x87   : > { %1364 = vmatpush3.bf16.msra.mxu0 %v1623_v0  ;;  %1376 = vmatpush3.bf16.msra.mxu1 %v1624_v1  ;;  %v1628_v5 = vld [vmem:[%s2066_s14 + $0x8] sm:$0xff]   ;;  %v1629_v6 = vld [vmem:[%s2214_s3] sm:$0xff]   ;;  %v1631_v7 = vld [vmem:[%s329_s15 + $0x10] sm:$0xff]   ;;  %s2117_s23 = scalar_lea.vmem [#allocation11], %s1264_s28  ;;  %s2262_s16 = sld [smem:[#allocation33_spill]] }
  0x88   : > { %1365 = vmatprep.mubr.msk.bf16.mxu0 %vm409_vm0, %v1625_v2  ;;  %1377 = vmatprep.mubr.msk.bf16.mxu1 %vm409_vm0, %v1625_v2  ;;  %v1632_v8 = vld [vmem:[%s329_s15 + $0x18] sm:$0xff]   ;;  %v1630_v9 = vld [vmem:[%s2214_s3 + $0x8] sm:$0xff]   ;;  %v1633_v10 = vld [vmem:[%s2066_s14 + $0x10] sm:$0xff]   ;;  %s1104_s13 = sshll.u32 %s2117_s23, 4  ;;  %s2146_s11 = scalar_lea.sflag [#allocation7], %s365_s19  ;;  %s2139_s13 = int_to_ptr.vmem [resolvable:$true] %s1104_s13 }
  0x89   : > { %1369 = vmatprep.subr.bf16.mxu0 %v1627_v4  ;;  %1381 = vmatprep.subr.bf16.mxu1 %v1628_v5  ;;  %v1634_v11 = vld [vmem:[%s2066_s14 + $0x18] sm:$0xff]   ;;  %v1635_v12 = vld [vmem:[#allocation10] sm:$0xff]   ;;  %v1636_v13 = vld [vmem:[#allocation10 + $0x8] sm:$0xff]   ;;  %s1671_s9 = scalar_lea.vmem %s2139_s13, 2048  ;;  %s1826_s15 = smov [#allocation11]  }
  0x8a   : > { %1366 = vmatmul.mubr.msk.bf16.vlgmr.msra.gmra.mrb[0].mxu0 %vm409_vm0, %v1626_v3  ;;  %1378 = vmatmul.mubr.msk.bf16.vlgmr.msra.gmra.mrb[0].mxu1 %vm409_vm0, %v1626_v3  ;;  %v1637_v14 = vld [vmem:[#allocation10 + $0x10] sm:$0xff]   ;;  %v1638_v15 = vld [vmem:[#allocation10 + $0x18] sm:$0xff]   ;;  %v1639_v16 = vld [vmem:[#allocation10 + $0x20] sm:$0xff]   ;;  %p1672_p12 = scmp.ne.s32.totalorder %s2139_s13, %s1671_s9  ;;  %s1675_s12 = sshll.u32 %s1826_s15, 4  ;;  %s1676_s12 = int_to_ptr.vmem [resolvable:$false] %s1675_s12 }
  0x8b   : > { %1370 = vmatpush3.bf16.msra.mxu0 %v1627_v4  ;;  %1371 = vmatprep.mubr.msk.bf16.mxu0 %vm409_vm0, %v1629_v6  ;;  %v1640_v17 = vld [vmem:[#allocation10 + $0x28] sm:$0xff]   ;;  %v1641_v18 = vld [vmem:[#allocation10 + $0x30] sm:$0xff]   ;;  %v1642_v19 = vld [vmem:[#allocation10 + $0x38] sm:$0xff]   ;;  %s1322_s7 = sshll.u32 %s2260_s10, 11  ;;  %s1677_s4 = scalar_lea.vmem %s1676_s12, 4096 }
  0x8c   : > { %1382 = vmatpush3.bf16.msra.mxu1 %v1628_v5  ;;  %1383 = vmatprep.mubr.msk.bf16.mxu1 %vm409_vm0, %v1629_v6  ;;  %p2263_p0 = scmp.ne.s32.totalorder %s2261_s26, 0  ;;  %p1678_p2 = scmp.lt.s32.totalorder %s2139_s13, %s1676_s12 }
  0x8d   : > { %1387 = vmatprep.subr.bf16.mxu0 %v1631_v7  ;;  %1399 = vmatprep.subr.bf16.mxu1 %v1632_v8  ;;  %s2137_s5 = scalar_lea.hbm %s2262_s16, %s1322_s7  ;;  %p1679_p7 = scmp.lt.s32.totalorder %s1677_s4, %s1671_s9 }
  0x8e   : > { %p1673_p1 = pnand %p1672_p12, %p2263_p0 }
  0x8f   : > { %p1680_p3 = por %p1679_p7, %p1678_p2 }
  0x90   : > { %p1674_p4 = pneg %p1673_p1 }
  0x92   : > { %p1681_p5 = pnand %p1680_p3, %p1674_p4 }
  0x96   : > { %1372 = vmatmul.mubr.msk.bf16.vlgmr.msra.gmra.mrb[0].mxu0 %vm409_vm0, %v1630_v9  ;;  %1384 = vmatmul.mubr.msk.bf16.vlgmr.msra.gmra.mrb[0].mxu1 %vm409_vm0, %v1630_v9 }
  0x97   : > { %1388 = vmatpush3.bf16.msra.mxu0 %v1631_v7  ;;  %1400 = vmatpush3.bf16.msra.mxu1 %v1632_v8 }
  0x98   : > { %1389 = vmatprep.mubr.msk.bf16.mxu0 %vm409_vm0, %v1625_v2  ;;  %1401 = vmatprep.mubr.msk.bf16.mxu1 %vm409_vm0, %v1625_v2 }
  0x99   : > { %1393 = vmatprep.subr.bf16.mxu0 %v1633_v10  ;;  %1405 = vmatprep.subr.bf16.mxu1 %v1634_v11 }
  0x9e   : > { %1390 = vmatmul.mubr.msk.bf16.vlgmr.msra.gmra.mrb[4].mxu0 %vm409_vm0, %v1626_v3  ;;  %1402 = vmatmul.mubr.msk.bf16.vlgmr.msra.gmra.mrb[4].mxu1 %vm409_vm0, %v1626_v3 }
  0x9f   : > { %1394 = vmatpush3.bf16.msra.mxu0 %v1633_v10  ;;  %1406 = vmatpush3.bf16.msra.mxu1 %v1634_v11 }
  0xa0   : > { %1395 = vmatprep.mubr.msk.bf16.mxu0 %vm409_vm0, %v1629_v6  ;;  %1407 = vmatprep.mubr.msk.bf16.mxu1 %vm409_vm0, %v1629_v6 }
  0xa1   : > { %1411 = vmatprep.subr.bf16.mxu0 %v1635_v12  ;;  %1443 = vmatprep.subr.bf16.mxu1 %v1635_v12 }
  0xaa   : > { %1396 = vmatmul.mubr.msk.bf16.vlgmr.msra.gmra.mrb[4].mxu0 %vm409_vm0, %v1630_v9  ;;  %1408 = vmatmul.mubr.msk.bf16.vlgmr.msra.gmra.mrb[4].mxu1 %vm409_vm0, %v1630_v9 }
  0xab   : > { %1412 = vmatpush3.bf16.msra.mxu0 %v1635_v12  ;;  %1451 = vmatpush3.bf16.msra.mxu1 %v1635_v12 }
  0xac   : > { %1413 = vmatprep.subr.bf16.mxu0 %v1636_v13  ;;  %1444 = vmatprep.subr.bf16.mxu1 %v1636_v13 }
  0xaf   : > { %1414 = vmatpush3.bf16.msra.mxu0 %v1636_v13  ;;  %1452 = vmatpush3.bf16.msra.mxu1 %v1636_v13 }
  0xb0   : > { %1415 = vmatprep.subr.bf16.mxu0 %v1637_v14  ;;  %1445 = vmatprep.subr.bf16.mxu1 %v1637_v14 }
  0xb3   : > { %1416 = vmatpush3.bf16.msra.mxu0 %v1637_v14  ;;  %1453 = vmatpush3.bf16.msra.mxu1 %v1637_v14 }
  0xb4   : > { %1417 = vmatprep.subr.bf16.mxu0 %v1638_v15  ;;  %1446 = vmatprep.subr.bf16.mxu1 %v1638_v15 }
  0xb7   : > { %1418 = vmatpush3.bf16.msra.mxu0 %v1638_v15  ;;  %1454 = vmatpush3.bf16.msra.mxu1 %v1638_v15 }
  0xb8   : > { %1419 = vmatprep.subr.bf16.mxu0 %v1639_v16  ;;  %1447 = vmatprep.subr.bf16.mxu1 %v1639_v16 }
  0xbb   : > { %1420 = vmatpush3.bf16.msra.mxu0 %v1639_v16  ;;  %1455 = vmatpush3.bf16.msra.mxu1 %v1639_v16 }
  0xbc   : > { %1421 = vmatprep.subr.bf16.mxu0 %v1640_v17  ;;  %1448 = vmatprep.subr.bf16.mxu1 %v1640_v17 }
  0xbf   : > { %1422 = vmatpush3.bf16.msra.mxu0 %v1640_v17  ;;  %1456 = vmatpush3.bf16.msra.mxu1 %v1640_v17 }
  0xc0   : > { %1423 = vmatprep.subr.bf16.mxu0 %v1641_v18  ;;  %1449 = vmatprep.subr.bf16.mxu1 %v1641_v18 }
  0xc3   : > { %1424 = vmatpush3.bf16.msra.mxu0 %v1641_v18  ;;  %1457 = vmatpush3.bf16.msra.mxu1 %v1641_v18 }
  0xc4   : > { %1425 = vmatprep.subr.bf16.mxu0 %v1642_v19  ;;  %1450 = vmatprep.subr.bf16.mxu1 %v1642_v19 }
  0xc7   : > { %1426 = vmatpush3.bf16.msra.mxu0 %v1642_v19  ;;  %1458 = vmatpush3.bf16.msra.mxu1 %v1642_v19 }
 0x169   : > { %v1373_v20 = vpop.f32.mrb[0].mxu0  ;;  %v1385_v21 = vpop.f32.mrb[0].mxu1 }
 0x16a   : > { %v521_v22 = vpop.f32.mrb[1].mxu0  ;;  %v641_v23 = vpop.f32.mrb[1].mxu1 }
 0x16b   : > { %v1374_v24 = vpop.f32.mrb[2].mxu0  ;;  %v1386_v26 = vpop.f32.mrb[2].mxu1 }
 0x16c   : > { %v537_v25 = vpack.c.bf16 %v1374_v24, %v1373_v20  ;;  %v524_v27 = vpop.f32.mrb[3].mxu0  ;;  %v657_v28 = vpack.c.bf16 %v1386_v26, %v1385_v21  ;;  %v644_v30 = vpop.f32.mrb[3].mxu1 }
 0x16d   : > { %v536_v29 = vpack.c.bf16 %v524_v27, %v521_v22  ;;  %v656_v31 = vpack.c.bf16 %v644_v30, %v641_v23 }
 0x16f   : > { %1427 = vmatprep.mubr.bf16.mxu0 %v536_v29 }
 0x170   : > { %1428 = vmatmul.mubr.bf16.vlgmr.msra.gmra.mrb[8].mxu0 %v537_v25 }
 0x171   : > { %1431 = vmatprep.mubr.bf16.mxu0 %v656_v31 }
 0x178   : > { %1432 = vmatmul.mubr.bf16.gmra.mrb[12].mxu0 %v657_v28 }
 0x17d   : > { %v1397_v32 = vpop.f32.mrb[4].mxu0  ;;  %v1409_v33 = vpop.f32.mrb[4].mxu1 }
 0x17e   : > { %v762_v34 = vpop.f32.mrb[5].mxu0  ;;  %v883_v35 = vpop.f32.mrb[5].mxu1 }
 0x17f   : > { %v1398_v36 = vpop.f32.mrb[6].mxu0  ;;  %v1410_v38 = vpop.f32.mrb[6].mxu1 }
 0x180   : > { %v778_v37 = vpack.c.bf16 %v1398_v36, %v1397_v32  ;;  %v765_v39 = vpop.f32.mrb[7].mxu0  ;;  %v899_v40 = vpack.c.bf16 %v1410_v38, %v1409_v33  ;;  %v886_v42 = vpop.f32.mrb[7].mxu1 }
 0x181   : > { %v777_v41 = vpack.c.bf16 %v765_v39, %v762_v34  ;;  %v898_v43 = vpack.c.bf16 %v886_v42, %v883_v35 }
 0x183   : > { %1435 = vmatprep.mubr.bf16.mxu1 %v777_v41 }
 0x184   : > { %1436 = vmatmul.mubr.bf16.vlgmr.msra.gmra.mrb[8].mxu1 %v778_v37 }
 0x185   : > { %1439 = vmatprep.mubr.bf16.mxu1 %v898_v43 }
 0x18c   : > { %1440 = vmatmul.mubr.bf16.gmra.mrb[12].mxu1 %v899_v40 }
 0x243   : > { %v1429_v44 = vpop.f32.mrb[8].mxu0 }
 0x244   : > { %1074 = vst [vmem:[%s2117_s23 + $0x10] sm:$0xff] %v1429_v44  ;;  %v1009_v45 = vpop.f32.mrb[9].mxu0 }
 0x245   : > { %1072 = vst [vmem:[%s2117_s23] sm:$0xff] %v1009_v45  ;;  %v1430_v46 = vpop.f32.mrb[10].mxu0 }
 0x246   : > { %1075 = vst [vmem:[%s2117_s23 + $0x18] sm:$0xff] %v1430_v46  ;;  %v1012_v47 = vpop.f32.mrb[11].mxu0 }
 0x247   : > { %1073 = vst [vmem:[%s2117_s23 + $0x8] sm:$0xff] %v1012_v47 }
 0x24b   : > { %v1433_v48 = vpop.f32.mrb[12].mxu0 }
 0x24c   : > { %1078 = vst [vmem:[%s2117_s23 + $0x30] sm:$0xff] %v1433_v48  ;;  %v1025_v49 = vpop.f32.mrb[13].mxu0 }
 0x24d   : > { %1076 = vst [vmem:[%s2117_s23 + $0x20] sm:$0xff] %v1025_v49  ;;  %v1434_v50 = vpop.f32.mrb[14].mxu0 }
 0x24e   : > { %1079 = vst [vmem:[%s2117_s23 + $0x38] sm:$0xff] %v1434_v50  ;;  %v1028_v51 = vpop.f32.mrb[15].mxu0 }
 0x24f   : > { %1077 = vst [vmem:[%s2117_s23 + $0x28] sm:$0xff] %v1028_v51 }
 0x257   : > { %v1437_v52 = vpop.f32.mrb[8].mxu1 }
 0x258   : > { %1082 = vst [vmem:[%s2117_s23 + $0x50] sm:$0xff] %v1437_v52  ;;  %v1041_v53 = vpop.f32.mrb[9].mxu1 }
 0x259   : > { %1080 = vst [vmem:[%s2117_s23 + $0x40] sm:$0xff] %v1041_v53  ;;  %v1438_v54 = vpop.f32.mrb[10].mxu1 }
 0x25a   : > { %1083 = vst [vmem:[%s2117_s23 + $0x58] sm:$0xff] %v1438_v54  ;;  %v1044_v55 = vpop.f32.mrb[11].mxu1 }
 0x25b   : > { %1081 = vst [vmem:[%s2117_s23 + $0x48] sm:$0xff] %v1044_v55 }
 0x25f   : > { %v1441_v56 = vpop.f32.mrb[12].mxu1 }
 0x260   : > { %1086 = vst [vmem:[%s2117_s23 + $0x70] sm:$0xff] %v1441_v56  ;;  %v1057_v57 = vpop.f32.mrb[13].mxu1 }
 0x261   : > { %1084 = vst [vmem:[%s2117_s23 + $0x60] sm:$0xff] %v1057_v57  ;;  %v1442_v58 = vpop.f32.mrb[14].mxu1 }
 0x262   : > { %1087 = vst [vmem:[%s2117_s23 + $0x78] sm:$0xff] %v1442_v58  ;;  %v1060_v59 = vpop.f32.mrb[15].mxu1 }
 0x263   : > { %1085 = vst [vmem:[%s2117_s23 + $0x68] sm:$0xff] %v1060_v59 }
 0x264   : > { %1684 = shalt.err (!%p1681_p5)
}
 0x265   : > { %s1685_s17 = scalar_lea.hbm %s2137_s5, 2048  ;;  %s1689_s20 = scalar_lea.hbm %s2262_s16, 4096 }
 0x266   : > { %p1686_p6 = scmp.ne.s32.totalorder %s2137_s5, %s1685_s17  ;;  %p1690_p8 = scmp.lt.u32.totalorder %s2137_s5, %s2262_s16 }
 0x267   : > { %p1691_p9 = scmp.lt.u32.totalorder %s1689_s20, %s1685_s17  ;;  %p1693_p1 = scmp.lt.u32.totalorder %s1685_s17, %s2137_s5 }
 0x268   : > { %p1687_p10 = pnand %p1686_p6, %p2263_p0 }
 0x269   : > { %p1692_p12 = por %p1691_p9, %p1690_p8 }
 0x26a   : > { %p1688_p11 = pneg %p1687_p10 }
 0x26b   : > { %p1694_p4 = por %p1693_p1, %p1692_p12 }
 0x26d   : > { %p1695_p2 = pnand %p1694_p4, %p1688_p11 }
 0x26f   : > { %1698 = shalt.err (!%p1695_p2)
}
 0x270   : > { %s1827_s19 = smov 128   ;;  %s1828_s28 = smov 8  }
 0x271   : > { %1497 = dma.vmem_to_hbm [thread:$0]  (%p2263_p0), %s2139_s13, 2048, %s2137_s5, %s2146_s11, %s1827_s19, %s1827_s19, %s1828_s28  }
 0x272 PF: > { %s2264_s23 = sld [smem:[#allocation22_spill]]  ;;  %s2265_s10 = sld [smem:[#allocation31_spill]] }
 0x278   : > { %s1119_s7 = sand.u32 1, %s2264_s23   ;;  %p2266_p7 = scmp.ne.s32.totalorder %s2265_s10, 0 }
 0x279   : > { %s1120_s22 = scalar_lea.sflag [#allocation7], %s1119_s7 }
 0x27a   : > { %p1504_p3 = pnand %p1247_p13, %p2266_p7 }
 0x27c   : > { %1760 = dma.done.wait (!%p1504_p3), %s1120_s22, 2048  }
 0x27d   : > { %1762 = vsyncadd (!%p1504_p3), %s1120_s22, 4294965248  ;;  %s25_s30 = sadd.s32 1, %s1809_s30   ;;  %s2267_s14 = sld [smem:[#allocation23_spill]] }
 0x27e   : > { %p22_p5 = scmp.ge.s32.totalorder %s25_s30, 4   ;;  %s2268_s22 = sld [smem:[#allocation29_spill]] }
 0x27f   : > { %s2269_s26 = sld [smem:[#allocation28_spill]]  ;;  %s2270_s13 = sld [smem:[#allocation24_spill]] }
 0x280   : > { %s2271_s27 = sld [smem:[#allocation27_spill]]  ;;  %s2272_s5 = sld [smem:[#allocation26_spill]] }
 0x281   : > { %s2273_s20 = smov %s1769_s21  ;;  %s2275_s23 = smov %s1781_s24 }
 0x282   : > { %s2276_s24 = smov %s1785_s25  ;;  %s2280_s28 = smov %s1805_s29 }
 0x283   : > { %s2274_s21 = smov %s2267_s14  ;;  %24 = sbr.rel (!%p22_p5) target bundleno = 15 (0xf), region = 121 }
 0x285   : > { %s2277_s25 = smov %s2269_s26  ;;  %s2278_s26 = smov %s1793_s0 }
 0x286   : > { %s2279_s0 = smov %s2270_s13  ;;  %s2281_s29 = smov %s2272_s5 }
 0x28a   :  { %1125 = vsyncpa [#allocation6], 1 }
 0x28b   :  { %1127 = vsyncpa [#allocation6 + $0x1], 1 }
 0x28c   :  { %1128 = vsyncpa [#allocation9], 1 }
 0x28d   :  { %1130 = vsyncpa [#allocation9 + $0x1], 1 }
 0x28e   :  { %1131 = vsyncpa [#allocation7], 1 }
 0x28f   :  { %1133 = vsyncpa [#allocation7 + $0x1], 1 }

// kernel: tpu_custom_call.1
= control target key start
LH: loop header
LB: loop body
LE: loop exit
PB: predicated region body
PF: predicated region fallthrough
CT: control target
= control target key end

     0   :  { %s2211_s0 = inlined_call_operand.<no memory space> [shape: s32[1], index: 0, kind: input, shape index: {}]   ;;  %s2212_s1 = inlined_call_operand.hbm [shape: bf16[2,4,32,128], index: 1, kind: input, shape index: {}]   ;;  %s2213_s2 = inlined_call_operand.hbm [shape: bf16[2,4,32,128], index: 2, kind: input, shape index: {}]   ;;  %s2214_s3 = inlined_call_operand.vmem [shape: bf16[1,2,32,16], index: 3, kind: input, shape index: {}]   ;;  %s2215_s4 = inlined_call_operand.hbm [shape: bf16[128,128], index: 4, kind: input, shape index: {}]   ;;  %s2216_s5 = inlined_call_operand.hbm [shape: f32[2,4,32,128], index: 5, kind: output, shape index: {}]  }
   0x1   :  { %2232 = sst [smem:[#allocation32_spill]] %s2215_s4 }
   0x2   :  { %2233 = sst [smem:[#allocation33_spill]] %s2216_s5 }
   0x3   :  { %10 = sst [smem:[#allocation4]] %s2211_s0 }
   0x4   :  { %11 = vsyncpa [#allocation6], 0 }
   0x5   :  { %13 = vsyncpa [#allocation6 + $0x1], 0 }
   0x6   :  { %14 = vsyncpa [#allocation9], 0 }
   0x7   :  { %16 = vsyncpa [#allocation9 + $0x1], 0 }
   0x8   :  { %17 = vsyncpa [#allocation7], 0 }
   0x9   :  { %19 = vsyncpa [#allocation7 + $0x1], 0  ;;  %s1862_s20 = smov 0   ;;  %s1864_s21 = smov 0  }
   0xa   :  { %s1866_s22 = smov 0   ;;  %s1868_s23 = smov 0  }
   0xb   :  { %s1870_s24 = smov 0   ;;  %s1872_s25 = smov 0  }
   0xc   :  { %s1874_s26 = smov 0   ;;  %s1876_s0 = smov 0  }
   0xd   :  { %s1878_s27 = smov 0   ;;  %s1880_s28 = smov 0  }
   0xe   :  { %s1882_s29 = smov 0   ;;  %s1884_s30 = smov 0  }
   0xf LB: > { %2234 = sst [smem:[#allocation22_spill]] %s1765_s20  ;;  %s1919_s6 = sadd.s32 4294967295, %s1809_s30   ;;  %s1809_s30 = sphi %s1884_s30, %s25_s30   ;;  %s1805_s29 = sphi %s1882_s29, %s2281_s29   ;;  %s1801_s28 = sphi %s1880_s28, %s2280_s28   ;;  %s1797_s27 = sphi %s1878_s27, %s2271_s27   ;;  %s1793_s0 = sphi %s1876_s0, %s2279_s0   ;;  %s1789_s26 = sphi %s1874_s26, %s2278_s26   ;;  %s1785_s25 = sphi %s1872_s25, %s2277_s25   ;;  %s1781_s24 = sphi %s1870_s24, %s2276_s24   ;;  %s1777_s23 = sphi %s1868_s23, %s2275_s23   ;;  %s1773_s22 = sphi %s1866_s22, %s2268_s22   ;;  %s1769_s21 = sphi %s1864_s21, %s2274_s21   ;;  %s1765_s20 = sphi %s1862_s20, %s2273_s20  }
  0x10   : > { %2235 = sst [smem:[#allocation23_spill]] %s1773_s22  ;;  %s1243_s7 = sadd.s32 4294967294, %s1809_s30  }
  0x11   : > { %2236 = sst [smem:[#allocation24_spill]] %s1797_s27  ;;  %s37_s8 = sadd.s32 1, %s1805_s29 }
  0x12   : > { %2237 = sst [smem:[#allocation25_spill]] %s1801_s28  ;;  %p39_p0 = scmp.ge.s32.totalorder %s37_s8, 2 }
  0x13   : > { %s48_s9 = sadd.s32 1, %s1797_s27  ;;  %p55_p1 = scmp.ne.s32.totalorder %s1797_s27, %s1793_s0 }
  0x14   : > { %p56_p2 = scmp.eq.s32.totalorder %s1809_s30, 0  ;;  %s2283_s8 = smov (%p39_p0, %s37_s8), 0 }
  0x15   : > { %2238 = sst [smem:[#allocation26_spill]] %s2283_s8  ;;  %p61_p4 = scmp.ne.s32.totalorder %s1793_s0, %s1789_s26 }
  0x16   : > { %p1931_p3 = por %p56_p2, %p55_p1  ;;  %s43_s11 = ssub.s32 %s1805_s29, %s2283_s8 }
  0x17   : > { %p2221_p5 = scmp.eq.s32.totalorder %s1919_s6, 0  ;;  %p46_p7 = scmp.eq.s32.totalorder %s43_s11, 0 }
  0x18   : > { %s2239_s10 = scalar_select %p1931_p3, 1, 0 }
  0x19   : > { %p1941_p6 = por %p2221_p5, %p61_p4  ;;  %s80_s13 = sadd.s32 1, %s1785_s25 }
  0x1a   : > { %s1947_s14 = scalar_select %p46_p7, %s1797_s27, %s48_s9  }
  0x1b   : > { %s2240_s12 = scalar_select %p1941_p6, 1, 0 }
  0x1c   : > { %2241 = sst [smem:[#allocation27_spill]] %s1947_s14  ;;  %p87_p8 = scmp.ne.s32.totalorder %s1785_s25, %s1781_s24 }
  0x1d   : > { %p93_p9 = scmp.ne.s32.totalorder %s1781_s24, %s1777_s23  ;;  %s155_s18 = sadd.s32 1, %s1773_s22 }
  0x1e   : > { %s1953_s15 = scalar_select %p46_p7, %s1785_s25, %s80_s13  }
  0x1f   : > { %p1957_p10 = por %p87_p8, %p56_p2  ;;  %p1963_p11 = por %p93_p9, %p2221_p5 }
  0x20   : > { %2242 = sst [smem:[#allocation28_spill]] %s1953_s15  ;;  %p165_p12 = scmp.ne.s32.totalorder %s1773_s22, %s1769_s21 }
  0x21   : > { %s2243_s16 = scalar_select %p1957_p10, 1, 0 }
  0x22   : > { %s2244_s17 = scalar_select %p1963_p11, 1, 0 }
  0x23   : > { %s1971_s19 = scalar_select %p46_p7, %s1773_s22, %s155_s18  }
  0x24   : > { %p166_p13 = scmp.eq.s32.totalorder %s1919_s6, 1  ;;  %p171_p0 = scmp.ne.s32.totalorder %s1769_s21, %s1765_s20 }
  0x25   : > { %2245 = sst [smem:[#allocation29_spill]] %s1971_s19  ;;  %p172_p1 = scmp.eq.s32.totalorder %s1243_s7, 1 }
  0x26   : > { %p1244_p4 = scmp.ge.s32.totalorder %s1809_s30, 1  ;;  %p1977_p6 = por %p166_p13, %p165_p12 }
  0x27   : > { %p179_p2 = scmp.lt.s32.totalorder %s1809_s30, 3  ;;  %p1982_p8 = por %p172_p1, %p171_p0 }
  0x28   : > { %s2246_s23 = scalar_select %p1977_p6, 1, 0 }
  0x29   : > { %s2248_s26 = scalar_select %p1982_p8, 1, 0 }
  0x2a   : > { %2247 = sst [smem:[#allocation30_spill]] %s2246_s23  ;;  %p1986_p9 = pnand %p1244_p4, %p179_p2 }
  0x2b   : > { %2249 = sst [smem:[#allocation31_spill]] %s2248_s26  ;;  %s1811_s11 = smov [#allocation10]  }
  0x2c   : > { %s2250_s9 = scalar_select %p1986_p9, 1, 0 }
  0x2d   : > { %s199_s13 = sshll.u32 %s1811_s11, 4  ;;  %p1499_p7 = pneg %p1986_p9  ;;  %s200_s13 = int_to_ptr.vmem [resolvable:$true] %s199_s13 }
  0x2e   : > { %s2252_s4 = sld [smem:[#allocation32_spill]] }
  0x2f   : > { %p1994_p12 = pnand %p1499_p7, %p2221_p5 }
  0x31   : > { %p1645_p0 = pneg %p1994_p12 }
  0x34   : > { %s1643_s14 = scalar_lea.hbm %s2252_s4, 1024 }
  0x35   : > { %p1644_p13 = scmp.ne.s32.totalorder %s2252_s4, %s1643_s14  ;;  %p1650_p2 = scmp.lt.u32.totalorder %s1643_s14, %s2252_s4 }
  0x37   : > { %p1646_p1 = pnand %p1645_p0, %p1644_p13 }
  0x39   : > { %p1647_p4 = pneg %p1646_p1 }
  0x3b   : > { %p1652_p7 = pnand %p1650_p2, %p1647_p4 }
  0x3d   : > { %1655 = shalt.err (!%p1652_p7)
}
  0x3e   : > { %s1656_s26 = scalar_lea.vmem %s200_s13, 1024  ;;  %p1664_p11 = scmp.lt.s32.totalorder %s200_s13, %s200_s13 }
  0x3f   : > { %p1657_p5 = scmp.ne.s32.totalorder %s200_s13, %s1656_s26  ;;  %p1665_p9 = scmp.lt.s32.totalorder %s1656_s26, %s1656_s26 }
  0x41   : > { %p1659_p8 = pnand %p1657_p5, %p1645_p0  ;;  %p1666_p10 = por %p1665_p9, %p1664_p11 }
  0x43   : > { %p1660_p6 = pneg %p1659_p8 }
  0x45   : > { %p1667_p3 = pnand %p1666_p10, %p1660_p6 }
  0x47   : > { %1670 = shalt.err (!%p1667_p3)
}
  0x48   : > { %s1812_s8 = smov 64   ;;  %s1813_s15 = smov 4  }
  0x49   : > { %1502 = dma.hbm_to_vmem [thread:$0]  (!%p1994_p12), %s2252_s4, 1024, %s200_s13, [#allocation9], %s1812_s8, %s1812_s8, %s1813_s15  }
  0x4a   : > { %p1247_p13 = scmp.ge.s32.totalorder %s1809_s30, 2 }
  0x4c   : > { %209 = sbr.rel (%p1247_p13) target bundleno = 115 (0x73), region = 24 }
  0x53   : > { %s213_s22 = sand.u32 1, %s1797_s27   ;;  %s218_s14 = sld [smem:[#allocation4]] }
  0x54   : > { %s1248_s26 = sshll.u32 %s213_s22, 5  ;;  %s1250_s7 = sshll.u32 %s1805_s29, 4 }
  0x55   : > { %p2253_p3 = scmp.ne.s32.totalorder %s2239_s10, 0  ;;  %s217_s19 = scalar_lea.vmem [#allocation5], %s1248_s26 }
  0x56   : > { %s239_s13 = sshll.u32 %s217_s19, 4  ;;  %s1814_s18 = smov 256   ;;  %s240_s13 = int_to_ptr.vmem [resolvable:$true] %s239_s13 }
  0x57   : > { %s1477_s11 = scalar_select %p2253_p3, [#allocation0], [#allocation16] }
  0x58   : > { %1478 = sst [smem:[#allocation13]] (%p2253_p3), %s1814_s18  ;;  %s1815_s20 = smov 128  }
  0x59   : > { %s231_s8 = sld [smem:[%s1477_s11]]   ;;  %s1249_s15 = sshll.u32 %s218_s14, 1 }
  0x5a   : > { %s224_s4 = sadd.s32 %s1250_s7, %s1249_s15  ;;  %1479 = sst [smem:[#allocation13 + $0x1]] (%p2253_p3), %s1815_s20 }
  0x5b   : > { %s1251_s27 = sshll.u32 %s224_s4, 6  ;;  %s1816_s19 = smov 2  }
  0x5c   : > { %s226_s26 = scalar_lea.hbm %s2212_s1, %s1251_s27  ;;  %1480 = sst [smem:[#allocation13 + $0x2]] (%p2253_p3), %s1816_s19 }
  0x5d   : > { %s1817_s14 = smov 64   ;;  %s1818_s15 = smov 4  }
  0x5e   : > { %1481 = sst [smem:[#allocation13 + $0x3]] (%p2253_p3), %s1817_s14  ;;  %s214_s4 = scalar_lea.sflag [#allocation6], %s213_s22 }
  0x5f   : > { %s1252_s11 = sshll.u32 %s231_s8, 26  ;;  %1482 = sst [smem:[#allocation13 + $0x4]] (%p2253_p3), %s1817_s14 }
  0x60   : > { %s1253_s28 = sadd.s32 134217728, %s1252_s11  ;;  %1483 = sst [smem:[#allocation13 + $0x5]] (%p2253_p3), %s1818_s15 }
  0x61   : > { %s1819_s18 = smov [#allocation12]  }
  0x62   : > { %1484 = dma.general (%p2253_p3), %s226_s26, 512, %s240_s13, %s214_s4, %s1819_s18, [#allocation13], %s1253_s28, 0  }
  0x63   : > { %s262_s5 = sand.u32 1, %s1809_s30   ;;  %s264_s20 = sand.u32 1, %s1785_s25  }
  0x64   : > { %s1254_s27 = sshll.u32 %s264_s20, 5  ;;  %s267_s23 = sld [smem:[#allocation4]] }
  0x65   : > { %p2254_p5 = scmp.ne.s32.totalorder %s2243_s16, 0  ;;  %s266_s19 = scalar_lea.vmem [#allocation8], %s1254_s27 }
  0x66   : > { %s289_s11 = sshll.u32 %s266_s19, 4  ;;  %s1820_s28 = smov 256   ;;  %s290_s11 = int_to_ptr.vmem [resolvable:$true] %s289_s11 }
  0x67   : > { %s1485_s8 = scalar_select %p2254_p5, [#allocation0], [#allocation17] }
  0x68   : > { %1486 = sst [smem:[#allocation15]] (%p2254_p5), %s1820_s28  ;;  %s1821_s10 = smov 128  }
  0x69   : > { %s281_s22 = sld [smem:[%s1485_s8]]   ;;  %s1822_s26 = smov 2  }
  0x6a   : > { %1487 = sst [smem:[#allocation15 + $0x1]] (%p2254_p5), %s1821_s10  ;;  %s1255_s13 = sshll.u32 %s267_s23, 1 }
  0x6b   : > { %1488 = sst [smem:[#allocation15 + $0x2]] (%p2254_p5), %s1822_s26  ;;  %s1149_s14 = sadd.s32 %s1255_s13, %s1250_s7 }
  0x6c   : > { %s1257_s15 = sshll.u32 %s1149_s14, 6  ;;  %s1823_s4 = smov 64  }
  0x6d   : > { %1489 = sst [smem:[#allocation15 + $0x3]] (%p2254_p5), %s1823_s4  ;;  %s1151_s27 = scalar_lea.hbm %s2213_s2, %s1257_s15 }
  0x6e   : > { %s1152_s19 = scalar_lea.hbm %s1151_s27, 128  ;;  %1490 = sst [smem:[#allocation15 + $0x4]] (%p2254_p5), %s1823_s4 }
  0x6f   : > { %s1258_s8 = sshll.u32 %s281_s22, 26  ;;  %s1824_s23 = smov 4  }
  0x70   : > { %s1259_s28 = sadd.s32 134217728, %s1258_s8  ;;  %1491 = sst [smem:[#allocation15 + $0x5]] (%p2254_p5), %s1824_s23 }
  0x71   : > { %s263_s10 = scalar_lea.sflag [#allocation9], %s262_s5  ;;  %s1825_s26 = smov [#allocation14]  }
  0x72   : > { %1492 = dma.general (%p2254_p5), %s1152_s19, 512, %s290_s11, %s263_s10, %s1825_s26, [#allocation15], %s1259_s28, 0  }
  0x73 PF: > { %p2255_p6 = scmp.ne.s32.totalorder %s2250_s9, 0 }
  0x74   : > { %s316_s7 = sand.u32 (!%p2255_p6), 1, %s1793_s0   ;;  %p2256_p10 = scmp.ne.s32.totalorder (!%p2255_p6), %s2240_s12, 0 }
  0x75   : > { %314 = sbr.rel (%p2255_p6) target bundleno = 626 (0x272), region = 36  ;;  %s1261_s13 = sshll.u32 (!%p2255_p6), %s316_s7, 5 }
  0x76   : > { %s317_s22 = scalar_lea.sflag (!%p2255_p6), [#allocation6], %s316_s7  ;;  %s2066_s14 = scalar_lea.vmem (!%p2255_p6), [#allocation5], %s1261_s13 }
  0x7c   : > { %1748 = dma.done.wait (%p2256_p10), %s317_s22, 512  }
  0x7d   : > { %1750 = vsyncadd (%p2256_p10), %s317_s22, 4294966784  ;;  %s325_s16 = sand.u32 1, %s1919_s6   ;;  %s327_s5 = sand.u32 1, %s1781_s24  }
  0x7e   : > { %s1262_s11 = sshll.u32 %s327_s5, 5  ;;  %s326_s9 = scalar_lea.sflag [#allocation9], %s325_s16 }
  0x7f   : > { %s329_s15 = scalar_lea.vmem [#allocation8], %s1262_s11  ;;  %p2257_p11 = scmp.ne.s32.totalorder %s2244_s17, 0 }
  0x81   : > { %1752 = dma.done.wait (%p2257_p11), %s326_s9, 512  }
  0x82   : > { %1754 = vsyncadd (%p2257_p11), %s326_s9, 4294966784  ;;  %p2258_p8 = scmp.eq.s32.totalorder %s1919_s6, 0 }
  0x84   : > { %1756 = dma.done.wait (%p2258_p8), [#allocation9], 1024   ;;  %p2259_p9 = pmov %p2258_p8 }
  0x85   : > { %v1623_v0 = vld [vmem:[%s329_s15] sm:$0xff]   ;;  %v1624_v1 = vld [vmem:[%s329_s15 + $0x8] sm:$0xff]   ;;  %vm409_vm0 = vcmask 130048   ;;  %v1625_v2 = vld [vmem:[%s2214_s3 + $0x10] sm:$0xff]   ;;  %s365_s19 = sand.u32 1, %s1769_s21   ;;  %s2260_s10 = sld [smem:[#allocation25_spill]] }
  0x86   : > { %1758 = vsyncadd (%p2259_p9), [#allocation9], 4294966272  ;;  %1363 = vmatprep.subr.bf16.mxu0 %v1623_v0  ;;  %1375 = vmatprep.subr.bf16.mxu1 %v1624_v1  ;;  %v1626_v3 = vld [vmem:[%s2214_s3 + $0x18] sm:$0xff]   ;;  %v1627_v4 = vld [vmem:[%s2066_s14] sm:$0xff]   ;;  %s1264_s28 = sshll.u32 %s365_s19, 7  ;;  %s2261_s26 = sld [smem:[#allocation30_spill]] }
  0x87   : > { %1364 = vmatpush3.bf16.msra.mxu0 %v1623_v0  ;;  %1376 = vmatpush3.bf16.msra.mxu1 %v1624_v1  ;;  %v1628_v5 = vld [vmem:[%s2066_s14 + $0x8] sm:$0xff]   ;;  %v1629_v6 = vld [vmem:[%s2214_s3] sm:$0xff]   ;;  %v1631_v7 = vld [vmem:[%s329_s15 + $0x10] sm:$0xff]   ;;  %s2117_s23 = scalar_lea.vmem [#allocation11], %s1264_s28  ;;  %s2262_s16 = sld [smem:[#allocation33_spill]] }
  0x88   : > { %1365 = vmatprep.mubr.msk.bf16.mxu0 %vm409_vm0, %v1625_v2  ;;  %1377 = vmatprep.mubr.msk.bf16.mxu1 %vm409_vm0, %v1625_v2  ;;  %v1632_v8 = vld [vmem:[%s329_s15 + $0x18] sm:$0xff]   ;;  %v1630_v9 = vld [vmem:[%s2214_s3 + $0x8] sm:$0xff]   ;;  %v1633_v10 = vld [vmem:[%s2066_s14 + $0x10] sm:$0xff]   ;;  %s1104_s13 = sshll.u32 %s2117_s23, 4  ;;  %s2146_s11 = scalar_lea.sflag [#allocation7], %s365_s19  ;;  %s2139_s13 = int_to_ptr.vmem [resolvable:$true] %s1104_s13 }
  0x89   : > { %1369 = vmatprep.subr.bf16.mxu0 %v1627_v4  ;;  %1381 = vmatprep.subr.bf16.mxu1 %v1628_v5  ;;  %v1634_v11 = vld [vmem:[%s2066_s14 + $0x18] sm:$0xff]   ;;  %v1635_v12 = vld [vmem:[#allocation10] sm:$0xff]   ;;  %v1636_v13 = vld [vmem:[#allocation10 + $0x8] sm:$0xff]   ;;  %s1671_s9 = scalar_lea.vmem %s2139_s13, 2048  ;;  %s1826_s15 = smov [#allocation11]  }
  0x8a   : > { %1366 = vmatmul.mubr.msk.bf16.vlgmr.msra.gmra.mrb[0].mxu0 %vm409_vm0, %v1626_v3  ;;  %1378 = vmatmul.mubr.msk.bf16.vlgmr.msra.gmra.mrb[0].mxu1 %vm409_vm0, %v1626_v3  ;;  %v1637_v14 = vld [vmem:[#allocation10 + $0x10] sm:$0xff]   ;;  %v1638_v15 = vld [vmem:[#allocation10 + $0x18] sm:$0xff]   ;;  %v1639_v16 = vld [vmem:[#allocation10 + $0x20] sm:$0xff]   ;;  %p1672_p12 = scmp.ne.s32.totalorder %s2139_s13, %s1671_s9  ;;  %s1675_s12 = sshll.u32 %s1826_s15, 4  ;;  %s1676_s12 = int_to_ptr.vmem [resolvable:$false] %s1675_s12 }
  0x8b   : > { %1370 = vmatpush3.bf16.msra.mxu0 %v1627_v4  ;;  %1371 = vmatprep.mubr.msk.bf16.mxu0 %vm409_vm0, %v1629_v6  ;;  %v1640_v17 = vld [vmem:[#allocation10 + $0x28] sm:$0xff]   ;;  %v1641_v18 = vld [vmem:[#allocation10 + $0x30] sm:$0xff]   ;;  %v1642_v19 = vld [vmem:[#allocation10 + $0x38] sm:$0xff]   ;;  %s1322_s7 = sshll.u32 %s2260_s10, 11  ;;  %s1677_s4 = scalar_lea.vmem %s1676_s12, 4096 }
  0x8c   : > { %1382 = vmatpush3.bf16.msra.mxu1 %v1628_v5  ;;  %1383 = vmatprep.mubr.msk.bf16.mxu1 %vm409_vm0, %v1629_v6  ;;  %p2263_p0 = scmp.ne.s32.totalorder %s2261_s26, 0  ;;  %p1678_p2 = scmp.lt.s32.totalorder %s2139_s13, %s1676_s12 }
  0x8d   : > { %1387 = vmatprep.subr.bf16.mxu0 %v1631_v7  ;;  %1399 = vmatprep.subr.bf16.mxu1 %v1632_v8  ;;  %s2137_s5 = scalar_lea.hbm %s2262_s16, %s1322_s7  ;;  %p1679_p7 = scmp.lt.s32.totalorder %s1677_s4, %s1671_s9 }
  0x8e   : > { %p1673_p1 = pnand %p1672_p12, %p2263_p0 }
  0x8f   : > { %p1680_p3 = por %p1679_p7, %p1678_p2 }
  0x90   : > { %p1674_p4 = pneg %p1673_p1 }
  0x92   : > { %p1681_p5 = pnand %p1680_p3, %p1674_p4 }
  0x96   : > { %1372 = vmatmul.mubr.msk.bf16.vlgmr.msra.gmra.mrb[0].mxu0 %vm409_vm0, %v1630_v9  ;;  %1384 = vmatmul.mubr.msk.bf16.vlgmr.msra.gmra.mrb[0].mxu1 %vm409_vm0, %v1630_v9 }
  0x97   : > { %1388 = vmatpush3.bf16.msra.mxu0 %v1631_v7  ;;  %1400 = vmatpush3.bf16.msra.mxu1 %v1632_v8 }
  0x98   : > { %1389 = vmatprep.mubr.msk.bf16.mxu0 %vm409_vm0, %v1625_v2  ;;  %1401 = vmatprep.mubr.msk.bf16.mxu1 %vm409_vm0, %v1625_v2 }
  0x99   : > { %1393 = vmatprep.subr.bf16.mxu0 %v1633_v10  ;;  %1405 = vmatprep.subr.bf16.mxu1 %v1634_v11 }
  0x9e   : > { %1390 = vmatmul.mubr.msk.bf16.vlgmr.msra.gmra.mrb[4].mxu0 %vm409_vm0, %v1626_v3  ;;  %1402 = vmatmul.mubr.msk.bf16.vlgmr.msra.gmra.mrb[4].mxu1 %vm409_vm0, %v1626_v3 }
  0x9f   : > { %1394 = vmatpush3.bf16.msra.mxu0 %v1633_v10  ;;  %1406 = vmatpush3.bf16.msra.mxu1 %v1634_v11 }
  0xa0   : > { %1395 = vmatprep.mubr.msk.bf16.mxu0 %vm409_vm0, %v1629_v6  ;;  %1407 = vmatprep.mubr.msk.bf16.mxu1 %vm409_vm0, %v1629_v6 }
  0xa1   : > { %1411 = vmatprep.subr.bf16.mxu0 %v1635_v12  ;;  %1443 = vmatprep.subr.bf16.mxu1 %v1635_v12 }
  0xaa   : > { %1396 = vmatmul.mubr.msk.bf16.vlgmr.msra.gmra.mrb[4].mxu0 %vm409_vm0, %v1630_v9  ;;  %1408 = vmatmul.mubr.msk.bf16.vlgmr.msra.gmra.mrb[4].mxu1 %vm409_vm0, %v1630_v9 }
  0xab   : > { %1412 = vmatpush3.bf16.msra.mxu0 %v1635_v12  ;;  %1451 = vmatpush3.bf16.msra.mxu1 %v1635_v12 }
  0xac   : > { %1413 = vmatprep.subr.bf16.mxu0 %v1636_v13  ;;  %1444 = vmatprep.subr.bf16.mxu1 %v1636_v13 }
  0xaf   : > { %1414 = vmatpush3.bf16.msra.mxu0 %v1636_v13  ;;  %1452 = vmatpush3.bf16.msra.mxu1 %v1636_v13 }
  0xb0   : > { %1415 = vmatprep.subr.bf16.mxu0 %v1637_v14  ;;  %1445 = vmatprep.subr.bf16.mxu1 %v1637_v14 }
  0xb3   : > { %1416 = vmatpush3.bf16.msra.mxu0 %v1637_v14  ;;  %1453 = vmatpush3.bf16.msra.mxu1 %v1637_v14 }
  0xb4   : > { %1417 = vmatprep.subr.bf16.mxu0 %v1638_v15  ;;  %1446 = vmatprep.subr.bf16.mxu1 %v1638_v15 }
  0xb7   : > { %1418 = vmatpush3.bf16.msra.mxu0 %v1638_v15  ;;  %1454 = vmatpush3.bf16.msra.mxu1 %v1638_v15 }
  0xb8   : > { %1419 = vmatprep.subr.bf16.mxu0 %v1639_v16  ;;  %1447 = vmatprep.subr.bf16.mxu1 %v1639_v16 }
  0xbb   : > { %1420 = vmatpush3.bf16.msra.mxu0 %v1639_v16  ;;  %1455 = vmatpush3.bf16.msra.mxu1 %v1639_v16 }
  0xbc   : > { %1421 = vmatprep.subr.bf16.mxu0 %v1640_v17  ;;  %1448 = vmatprep.subr.bf16.mxu1 %v1640_v17 }
  0xbf   : > { %1422 = vmatpush3.bf16.msra.mxu0 %v1640_v17  ;;  %1456 = vmatpush3.bf16.msra.mxu1 %v1640_v17 }
  0xc0   : > { %1423 = vmatprep.subr.bf16.mxu0 %v1641_v18  ;;  %1449 = vmatprep.subr.bf16.mxu1 %v1641_v18 }
  0xc3   : > { %1424 = vmatpush3.bf16.msra.mxu0 %v1641_v18  ;;  %1457 = vmatpush3.bf16.msra.mxu1 %v1641_v18 }
  0xc4   : > { %1425 = vmatprep.subr.bf16.mxu0 %v1642_v19  ;;  %1450 = vmatprep.subr.bf16.mxu1 %v1642_v19 }
  0xc7   : > { %1426 = vmatpush3.bf16.msra.mxu0 %v1642_v19  ;;  %1458 = vmatpush3.bf16.msra.mxu1 %v1642_v19 }
 0x169   : > { %v1373_v20 = vpop.f32.mrb[0].mxu0  ;;  %v1385_v21 = vpop.f32.mrb[0].mxu1 }
 0x16a   : > { %v521_v22 = vpop.f32.mrb[1].mxu0  ;;  %v641_v23 = vpop.f32.mrb[1].mxu1 }
 0x16b   : > { %v1374_v24 = vpop.f32.mrb[2].mxu0  ;;  %v1386_v26 = vpop.f32.mrb[2].mxu1 }
 0x16c   : > { %v537_v25 = vpack.c.bf16 %v1374_v24, %v1373_v20  ;;  %v524_v27 = vpop.f32.mrb[3].mxu0  ;;  %v657_v28 = vpack.c.bf16 %v1386_v26, %v1385_v21  ;;  %v644_v30 = vpop.f32.mrb[3].mxu1 }
 0x16d   : > { %v536_v29 = vpack.c.bf16 %v524_v27, %v521_v22  ;;  %v656_v31 = vpack.c.bf16 %v644_v30, %v641_v23 }
 0x16f   : > { %1427 = vmatprep.mubr.bf16.mxu0 %v536_v29 }
 0x170   : > { %1428 = vmatmul.mubr.bf16.vlgmr.msra.gmra.mrb[8].mxu0 %v537_v25 }
 0x171   : > { %1431 = vmatprep.mubr.bf16.mxu0 %v656_v31 }
 0x178   : > { %1432 = vmatmul.mubr.bf16.gmra.mrb[12].mxu0 %v657_v28 }
 0x17d   : > { %v1397_v32 = vpop.f32.mrb[4].mxu0  ;;  %v1409_v33 = vpop.f32.mrb[4].mxu1 }
 0x17e   : > { %v762_v34 = vpop.f32.mrb[5].mxu0  ;;  %v883_v35 = vpop.f32.mrb[5].mxu1 }
 0x17f   : > { %v1398_v36 = vpop.f32.mrb[6].mxu0  ;;  %v1410_v38 = vpop.f32.mrb[6].mxu1 }
 0x180   : > { %v778_v37 = vpack.c.bf16 %v1398_v36, %v1397_v32  ;;  %v765_v39 = vpop.f32.mrb[7].mxu0  ;;  %v899_v40 = vpack.c.bf16 %v1410_v38, %v1409_v33  ;;  %v886_v42 = vpop.f32.mrb[7].mxu1 }
 0x181   : > { %v777_v41 = vpack.c.bf16 %v765_v39, %v762_v34  ;;  %v898_v43 = vpack.c.bf16 %v886_v42, %v883_v35 }
 0x183   : > { %1435 = vmatprep.mubr.bf16.mxu1 %v777_v41 }
 0x184   : > { %1436 = vmatmul.mubr.bf16.vlgmr.msra.gmra.mrb[8].mxu1 %v778_v37 }
 0x185   : > { %1439 = vmatprep.mubr.bf16.mxu1 %v898_v43 }
 0x18c   : > { %1440 = vmatmul.mubr.bf16.gmra.mrb[12].mxu1 %v899_v40 }
 0x243   : > { %v1429_v44 = vpop.f32.mrb[8].mxu0 }
 0x244   : > { %1074 = vst [vmem:[%s2117_s23 + $0x10] sm:$0xff] %v1429_v44  ;;  %v1009_v45 = vpop.f32.mrb[9].mxu0 }
 0x245   : > { %1072 = vst [vmem:[%s2117_s23] sm:$0xff] %v1009_v45  ;;  %v1430_v46 = vpop.f32.mrb[10].mxu0 }
 0x246   : > { %1075 = vst [vmem:[%s2117_s23 + $0x18] sm:$0xff] %v1430_v46  ;;  %v1012_v47 = vpop.f32.mrb[11].mxu0 }
 0x247   : > { %1073 = vst [vmem:[%s2117_s23 + $0x8] sm:$0xff] %v1012_v47 }
 0x24b   : > { %v1433_v48 = vpop.f32.mrb[12].mxu0 }
 0x24c   : > { %1078 = vst [vmem:[%s2117_s23 + $0x30] sm:$0xff] %v1433_v48  ;;  %v1025_v49 = vpop.f32.mrb[13].mxu0 }
 0x24d   : > { %1076 = vst [vmem:[%s2117_s23 + $0x20] sm:$0xff] %v1025_v49  ;;  %v1434_v50 = vpop.f32.mrb[14].mxu0 }
 0x24e   : > { %1079 = vst [vmem:[%s2117_s23 + $0x38] sm:$0xff] %v1434_v50  ;;  %v1028_v51 = vpop.f32.mrb[15].mxu0 }
 0x24f   : > { %1077 = vst [vmem:[%s2117_s23 + $0x28] sm:$0xff] %v1028_v51 }
 0x257   : > { %v1437_v52 = vpop.f32.mrb[8].mxu1 }
 0x258   : > { %1082 = vst [vmem:[%s2117_s23 + $0x50] sm:$0xff] %v1437_v52  ;;  %v1041_v53 = vpop.f32.mrb[9].mxu1 }
 0x259   : > { %1080 = vst [vmem:[%s2117_s23 + $0x40] sm:$0xff] %v1041_v53  ;;  %v1438_v54 = vpop.f32.mrb[10].mxu1 }
 0x25a   : > { %1083 = vst [vmem:[%s2117_s23 + $0x58] sm:$0xff] %v1438_v54  ;;  %v1044_v55 = vpop.f32.mrb[11].mxu1 }
 0x25b   : > { %1081 = vst [vmem:[%s2117_s23 + $0x48] sm:$0xff] %v1044_v55 }
 0x25f   : > { %v1441_v56 = vpop.f32.mrb[12].mxu1 }
 0x260   : > { %1086 = vst [vmem:[%s2117_s23 + $0x70] sm:$0xff] %v1441_v56  ;;  %v1057_v57 = vpop.f32.mrb[13].mxu1 }
 0x261   : > { %1084 = vst [vmem:[%s2117_s23 + $0x60] sm:$0xff] %v1057_v57  ;;  %v1442_v58 = vpop.f32.mrb[14].mxu1 }
 0x262   : > { %1087 = vst [vmem:[%s2117_s23 + $0x78] sm:$0xff] %v1442_v58  ;;  %v1060_v59 = vpop.f32.mrb[15].mxu1 }
 0x263   : > { %1085 = vst [vmem:[%s2117_s23 + $0x68] sm:$0xff] %v1060_v59 }
 0x264   : > { %1684 = shalt.err (!%p1681_p5)
}
 0x265   : > { %s1685_s17 = scalar_lea.hbm %s2137_s5, 2048  ;;  %s1689_s20 = scalar_lea.hbm %s2262_s16, 4096 }
 0x266   : > { %p1686_p6 = scmp.ne.s32.totalorder %s2137_s5, %s1685_s17  ;;  %p1690_p8 = scmp.lt.u32.totalorder %s2137_s5, %s2262_s16 }
 0x267   : > { %p1691_p9 = scmp.lt.u32.totalorder %s1689_s20, %s1685_s17  ;;  %p1693_p1 = scmp.lt.u32.totalorder %s1685_s17, %s2137_s5 }
 0x268   : > { %p1687_p10 = pnand %p1686_p6, %p2263_p0 }
 0x269   : > { %p1692_p12 = por %p1691_p9, %p1690_p8 }
 0x26a   : > { %p1688_p11 = pneg %p1687_p10 }
 0x26b   : > { %p1694_p4 = por %p1693_p1, %p1692_p12 }
 0x26d   : > { %p1695_p2 = pnand %p1694_p4, %p1688_p11 }
 0x26f   : > { %1698 = shalt.err (!%p1695_p2)
}
 0x270   : > { %s1827_s19 = smov 128   ;;  %s1828_s28 = smov 8  }
 0x271   : > { %1497 = dma.vmem_to_hbm [thread:$0]  (%p2263_p0), %s2139_s13, 2048, %s2137_s5, %s2146_s11, %s1827_s19, %s1827_s19, %s1828_s28  }
 0x272 PF: > { %s2264_s23 = sld [smem:[#allocation22_spill]]  ;;  %s2265_s10 = sld [smem:[#allocation31_spill]] }
 0x278   : > { %s1119_s7 = sand.u32 1, %s2264_s23   ;;  %p2266_p7 = scmp.ne.s32.totalorder %s2265_s10, 0 }
 0x279   : > { %s1120_s22 = scalar_lea.sflag [#allocation7], %s1119_s7 }
 0x27a   : > { %p1504_p3 = pnand %p1247_p13, %p2266_p7 }
 0x27c   : > { %1760 = dma.done.wait (!%p1504_p3), %s1120_s22, 2048  }
 0x27d   : > { %1762 = vsyncadd (!%p1504_p3), %s1120_s22, 4294965248  ;;  %s25_s30 = sadd.s32 1, %s1809_s30   ;;  %s2267_s14 = sld [smem:[#allocation23_spill]] }
 0x27e   : > { %p22_p5 = scmp.ge.s32.totalorder %s25_s30, 4   ;;  %s2268_s22 = sld [smem:[#allocation29_spill]] }
 0x27f   : > { %s2269_s26 = sld [smem:[#allocation28_spill]]  ;;  %s2270_s13 = sld [smem:[#allocation24_spill]] }
 0x280   : > { %s2271_s27 = sld [smem:[#allocation27_spill]]  ;;  %s2272_s5 = sld [smem:[#allocation26_spill]] }
 0x281   : > { %s2273_s20 = smov %s1769_s21  ;;  %s2275_s23 = smov %s1781_s24 }
 0x282   : > { %s2276_s24 = smov %s1785_s25  ;;  %s2280_s28 = smov %s1805_s29 }
 0x283   : > { %s2274_s21 = smov %s2267_s14  ;;  %24 = sbr.rel (!%p22_p5) target bundleno = 15 (0xf), region = 121 }
 0x285   : > { %s2277_s25 = smov %s2269_s26  ;;  %s2278_s26 = smov %s1793_s0 }
 0x286   : > { %s2279_s0 = smov %s2270_s13  ;;  %s2281_s29 = smov %s2272_s5 }
 0x28a   :  { %1125 = vsyncpa [#allocation6], 1 }
 0x28b   :  { %1127 = vsyncpa [#allocation6 + $0x1], 1 }
 0x28c   :  { %1128 = vsyncpa [#allocation9], 1 }
 0x28d   :  { %1130 = vsyncpa [#allocation9 + $0x1], 1 }
 0x28e   :  { %1131 = vsyncpa [#allocation7], 1 }
 0x28f   :  { %1133 = vsyncpa [#allocation7 + $0x1], 1 }

</bundles_post_ra>
